<compile_context>
chip_gen: v7x
topology: tpu7x:2x2x1
jax: 0.10.0
libtpu: 0.0.40
codegen_flags: <defaults>
</compile_context>

<pallas_src>
import functools

import jax
import jax.numpy as jnp
from jax.experimental import pallas as pl
from jax.experimental.pallas import tpu as pltpu


# ----------------------------------------------------------------------------
# Fused Pallas kernel: multi-layer LSTM + fc + sigmoid, single invocation.
# ----------------------------------------------------------------------------
def _lstm_net_kernel(*refs, num_layers, hidden_size, batch, seq_len,
                     compute_dtype):
    """refs layout (all whole-array VMEM blocks, no grid, no scratch):
      [0]                x_tb      (T*B, F_in) f32, time-major flattened
      [1], [2], [3]      layer 0:  W_ih (F, 4H) cd, W_hh (H, 4H) cd,
                                   bias (1, 4H) f32 (= b_ih + b_hh)
      for l = 1..L-1:
      [4+2(l-1)], [5+2(l-1)]       W_cat_l ([W_ih_l; W_hh_l], (2H, 4H)) cd,
                                   bias_l (1, 4H) f32
      [n_in-2], [n_in-1] fc:       fc_w (H, O_pad) cd, fc_b (1, O_pad) f32
      [n_in]             out       (B, O_pad) f32
    """
    H = hidden_size
    B, T, L = batch, seq_len, num_layers
    cd = compute_dtype

    x_ref = refs[0]
    w_ih0 = refs[1][...]                      # (F, 4H)  compute dtype
    w_hh0 = refs[2][...]                      # (H, 4H)  compute dtype
    b0 = refs[3][...]                         # (1, 4H)  f32
    w_cat = [refs[4 + 2 * (l - 1)][...] for l in range(1, L)]   # (2H, 4H) cd
    b_cat = [refs[5 + 2 * (l - 1)][...] for l in range(1, L)]   # (1, 4H)  f32
    n_in = 4 + 2 * (L - 1) + 2
    fc_w = refs[n_in - 2][...]                # (H, O_pad) compute dtype
    fc_b = refs[n_in - 1][...]                # (1, O_pad) f32
    out_ref = refs[n_in]                      # (B, O_pad) f32

    # ---- Layer-0 hoisted input projection + bias: ONE batched MXU matmul. ---
    xp0 = jnp.dot(x_ref[...].astype(cd), w_ih0,
                  preferred_element_type=jnp.float32) + b0      # (T*B, 4H) f32
    # Register-resident per-timestep slices (time-major => contiguous rows).
    xp0_t = [xp0[t * B:(t + 1) * B, :] for t in range(T)]

    # ---- Register-resident LSTM state; NO VMEM scratch on the serial path. --
    h = [jnp.zeros((B, H), jnp.float32) for _ in range(L)]
    c = [jnp.zeros((B, H), jnp.float32) for _ in range(L)]
    outs = [[None] * T for _ in range(L)]     # h_l(t) values (vreg-resident)

    # ---- Wavefront over (layer, time): slot s runs layer l at t = s - l, so
    #      layer l step t and layer l-1 step t+1 are independent chains. ------
    for s in range(T + L - 1):
        for l in range(L):
            t = s - l
            if t < 0 or t >= T:
                continue
            if l == 0:
                # Recurrent-only matmul; input projection already hoisted.
                gates = xp0_t[t] + jnp.dot(
                    h[0].astype(cd), w_hh0, preferred_element_type=jnp.float32)
            else:
                # Fused input+recurrent matmul: [h_{l-1}(t), h_l(t-1)] @ W_cat.
                inp = jnp.concatenate([outs[l - 1][t], h[l]], axis=-1)
                gates = jnp.dot(inp.astype(cd), w_cat[l - 1],
                                preferred_element_type=jnp.float32) + b_cat[l - 1]
            # Gate math: full-width sigmoid (i/f/o lanes), tanh only on g.
            sg = jax.nn.sigmoid(gates)                     # (B, 4H)  EUP
            i_g = sg[:, 0 * H:1 * H]
            f_g = sg[:, 1 * H:2 * H]
            o_g = sg[:, 3 * H:4 * H]
            g_g = jnp.tanh(gates[:, 2 * H:3 * H])          # (B, H)   EUP
            c[l] = f_g * c[l] + i_g * g_g                  # f32 VPU
            h[l] = o_g * jnp.tanh(c[l])
            outs[l][t] = h[l]

    # ---- fc + sigmoid head on the final hidden state (== out[:, -1, :]). ----
    # O padded to a full 128-lane multiple -> unmasked full-lane store.
    logits = jnp.dot(h[L - 1].astype(cd), fc_w,
                     preferred_element_type=jnp.float32) + fc_b
    out_ref[...] = jax.nn.sigmoid(logits).astype(out_ref.dtype)


# ----------------------------------------------------------------------------
# Wrapper
# ----------------------------------------------------------------------------
@functools.partial(jax.jit, static_argnames=("compute_dtype",))
def lstm_net_forward(x, params, compute_dtype=jnp.bfloat16):
    """x: (B, T, input_size) batch-first, like the PyTorch module."""
    num_layers = len(params["lstm"])
    H = params["lstm"][0][1].shape[0]            # W_hh^T is (H, 4H)
    B, T, F = x.shape
    O = params["fc_w_t"].shape[1]
    O_pad = ((O + 127) // 128) * 128             # full-lane final store

    # Time-major flatten of x at the XLA level (free metadata / tiny copy);
    # the kernel then slices contiguous (B, 4H) rows per timestep.
    x_tb = jnp.transpose(x, (1, 0, 2)).reshape(T * B, F)

    w_ih0_t, w_hh0_t, bias0 = params["lstm"][0]
    inputs = [x_tb,
              w_ih0_t.astype(compute_dtype),
              w_hh0_t.astype(compute_dtype),
              bias0]
    for layer in range(1, num_layers):
        w_ih_t, w_hh_t, bias = params["lstm"][layer]
        # Pre-concatenate [W_ih; W_hh] so the kernel does one fused matmul/step.
        w_cat = jnp.concatenate([w_ih_t, w_hh_t], axis=0)   # (2H, 4H)
        inputs += [w_cat.astype(compute_dtype), bias]
    fc_w_pad = jnp.pad(params["fc_w_t"], ((0, 0), (0, O_pad - O)))
    fc_b_pad = jnp.pad(params["fc_b"], ((0, 0), (0, O_pad - O)))
    inputs += [fc_w_pad.astype(compute_dtype), fc_b_pad]

    kernel = functools.partial(
        _lstm_net_kernel, num_layers=num_layers, hidden_size=H,
        batch=B, seq_len=T, compute_dtype=compute_dtype)

    # Advisory cost estimate so XLA can schedule neighbours around this
    # latency-bound call.
    flops = 2 * (T * B * F * 4 * H                 # layer-0 hoisted projection
                 + T * B * H * 4 * H               # layer-0 recurrence
                 + (num_layers - 1) * T * B * 2 * H * 4 * H   # fused layers >=1
                 + B * H * O_pad)                  # fc head
    transcendentals = T * num_layers * B * 6 * H + B * O_pad
    bytes_accessed = int(sum(int(a.size) * a.dtype.itemsize for a in inputs)
                         + B * O_pad * 4)

    # NOTE: grid-less single-TC call is right at B=2.  When B grows: pad B to
    # a sublane multiple and add a parallel batch grid axis (v7x has 2 TCs);
    # if T/H/L grow, move to lax.fori_loop(unroll=2..4) + bf16 time-major
    # scratch sized against v7x's 64 MiB VMEM.
    out = pl.pallas_call(
        kernel,
        out_shape=jax.ShapeDtypeStruct((B, O_pad), jnp.float32),
        cost_estimate=pl.CostEstimate(flops=flops,
                                      transcendentals=transcendentals,
                                      bytes_accessed=bytes_accessed),
    )(*inputs)
    return out[:, :O]


# ----------------------------------------------------------------------------
# Deterministic parameter init (PyTorch-style U(-1/sqrt(H), 1/sqrt(H)))
# ----------------------------------------------------------------------------
def init_params(key, input_size, hidden_size, num_layers, output_size):
    k = 1.0 / jnp.sqrt(hidden_size)
    params = {"lstm": []}
    for layer in range(num_layers):
        in_sz = input_size if layer == 0 else hidden_size
        key, k1, k2, k3, k4 = jax.random.split(key, 5)
        w_ih = jax.random.uniform(k1, (4 * hidden_size, in_sz), jnp.float32, -k, k)
        w_hh = jax.random.uniform(k2, (4 * hidden_size, hidden_size), jnp.float32, -k, k)
        b_ih = jax.random.uniform(k3, (4 * hidden_size,), jnp.float32, -k, k)
        b_hh = jax.random.uniform(k4, (4 * hidden_size,), jnp.float32, -k, k)
        params["lstm"].append(
            (w_ih.T, w_hh.T, (b_ih + b_hh).reshape(1, 4 * hidden_size)))
    key, k5, k6 = jax.random.split(key, 3)
    fc_w = jax.random.uniform(k5, (output_size, hidden_size), jnp.float32, -k, k)
    fc_b = jax.random.uniform(k6, (output_size,), jnp.float32, -k, k)
    params["fc_w_t"] = fc_w.T
    params["fc_b"] = fc_b.reshape(1, output_size)
    return params


# ----------------------------------------------------------------------------
# Pure-JAX f32 reference (for verification)
# ----------------------------------------------------------------------------
def reference_forward(x, params, num_layers, hidden_size):
    B = x.shape[0]
    out = x
    for layer in range(num_layers):
        w_ih_t, w_hh_t, bias = params["lstm"][layer]
        h = jnp.zeros((B, hidden_size), jnp.float32)
        c = jnp.zeros((B, hidden_size), jnp.float32)

        def step(carry, x_t):
            h, c = carry
            gates = x_t @ w_ih_t + h @ w_hh_t + bias
            i = jax.nn.sigmoid(gates[:, 0 * hidden_size:1 * hidden_size])
            f = jax.nn.sigmoid(gates[:, 1 * hidden_size:2 * hidden_size])
            g = jnp.tanh(gates[:, 2 * hidden_size:3 * hidden_size])
            o = jax.nn.sigmoid(gates[:, 3 * hidden_size:4 * hidden_size])
            c = f * c + i * g
            h = o * jnp.tanh(c)
            return (h, c), h

        (_, _), hs = jax.lax.scan(step, (h, c), jnp.transpose(out, (1, 0, 2)))
        out = jnp.transpose(hs, (1, 0, 2))
    h_last = out[:, -1, :]
    return jax.nn.sigmoid(h_last @ params["fc_w_t"] + params["fc_b"])


if __name__ == "__main__":
    batch, seq, input_size = 2, 8, 8
    hidden_size, num_layers, output_size = 32, 2, 45

    key = jax.random.PRNGKey(0)
    key, pkey, xkey = jax.random.split(key, 3)
    params = init_params(pkey, input_size, hidden_size, num_layers, output_size)
    x = jax.random.normal(xkey, (batch, seq, input_size), jnp.float32)

    ref = reference_forward(x, params, num_layers, hidden_size)

    # f32 compute path: must match the f32 reference tightly.
    out_f32 = jax.block_until_ready(
        lstm_net_forward(x, params, compute_dtype=jnp.float32))
    assert out_f32.shape == (batch, output_size)
    assert jnp.allclose(out_f32, ref, atol=1e-5, rtol=1e-5), (
        f"f32 kernel mismatch: max|d|={jnp.max(jnp.abs(out_f32 - ref))}")

    # bf16-MXU production path (f32 accumulation + f32 gate math): looser tol.
    out_bf16 = jax.block_until_ready(
        lstm_net_forward(x, params, compute_dtype=jnp.bfloat16))
    assert out_bf16.shape == (batch, output_size)
    assert jnp.allclose(out_bf16, ref, atol=3e-2, rtol=3e-2), (
        f"bf16 kernel mismatch: max|d|={jnp.max(jnp.abs(out_bf16 - ref))}")

    print("KERNEL_OK")
</pallas_src>

<mosaic_0001>
module attributes {stable_mosaic.version = 11 : i64} {
  func.func @_lstm_net_kernel(%arg0: memref<16x8xf32, #tpu.memory_space<vmem>>, %arg1: memref<8x128xf32, #tpu.memory_space<vmem>>, %arg2: memref<32x128xf32, #tpu.memory_space<vmem>>, %arg3: memref<1x128xf32, #tpu.memory_space<vmem>>, %arg4: memref<64x128xf32, #tpu.memory_space<vmem>>, %arg5: memref<1x128xf32, #tpu.memory_space<vmem>>, %arg6: memref<32x128xf32, #tpu.memory_space<vmem>>, %arg7: memref<1x128xf32, #tpu.memory_space<vmem>>, %arg8: memref<2x128xf32, #tpu.memory_space<vmem>>) attributes {dimension_semantics = [], scalar_prefetch = 0 : i64, scratch_operands = 0 : i64, tpu.core_type = #tpu.core_type<tc>} {
    %c0 = arith.constant 0 : index
    %c0_0 = arith.constant 0 : index
    %0 = vector.load %arg1[%c0, %c0_0] : memref<8x128xf32, #tpu.memory_space<vmem>>, vector<8x128xf32>
    %c0_1 = arith.constant 0 : index
    %c0_2 = arith.constant 0 : index
    %1 = vector.load %arg2[%c0_1, %c0_2] : memref<32x128xf32, #tpu.memory_space<vmem>>, vector<32x128xf32>
    %c0_3 = arith.constant 0 : index
    %c0_4 = arith.constant 0 : index
    %2 = vector.load %arg3[%c0_3, %c0_4] : memref<1x128xf32, #tpu.memory_space<vmem>>, vector<1x128xf32>
    %c0_5 = arith.constant 0 : index
    %c0_6 = arith.constant 0 : index
    %3 = vector.load %arg4[%c0_5, %c0_6] : memref<64x128xf32, #tpu.memory_space<vmem>>, vector<64x128xf32>
    %c0_7 = arith.constant 0 : index
    %c0_8 = arith.constant 0 : index
    %4 = vector.load %arg5[%c0_7, %c0_8] : memref<1x128xf32, #tpu.memory_space<vmem>>, vector<1x128xf32>
    %c0_9 = arith.constant 0 : index
    %c0_10 = arith.constant 0 : index
    %5 = vector.load %arg6[%c0_9, %c0_10] : memref<32x128xf32, #tpu.memory_space<vmem>>, vector<32x128xf32>
    %c0_11 = arith.constant 0 : index
    %c0_12 = arith.constant 0 : index
    %6 = vector.load %arg7[%c0_11, %c0_12] : memref<1x128xf32, #tpu.memory_space<vmem>>, vector<1x128xf32>
    %c0_13 = arith.constant 0 : index
    %c0_14 = arith.constant 0 : index
    %7 = vector.load %arg0[%c0_13, %c0_14] : memref<16x8xf32, #tpu.memory_space<vmem>>, vector<16x8xf32>
    %cst = arith.constant dense<0.000000e+00> : vector<16x128xf32>
    %8 = tpu.matmul %7, %0, %cst {dimension_numbers = #tpu.dot_dimension_numbers<[1], [0], [0], [1], [0, 0, 1, 1], [], []>} : vector<16x8xf32>, vector<8x128xf32>, vector<16x128xf32> -> vector<16x128xf32>
    %9 = vector.broadcast %2 : vector<1x128xf32> to vector<16x128xf32>
    %10 = arith.addf %8, %9 : vector<16x128xf32>
    %11 = vector.extract_strided_slice %10 {offsets = [0, 0], sizes = [2, 128], strides = [1, 1]} : vector<16x128xf32> to vector<2x128xf32>
    %12 = vector.extract_strided_slice %10 {offsets = [2, 0], sizes = [2, 128], strides = [1, 1]} : vector<16x128xf32> to vector<2x128xf32>
    %13 = vector.extract_strided_slice %10 {offsets = [4, 0], sizes = [2, 128], strides = [1, 1]} : vector<16x128xf32> to vector<2x128xf32>
    %14 = vector.extract_strided_slice %10 {offsets = [6, 0], sizes = [2, 128], strides = [1, 1]} : vector<16x128xf32> to vector<2x128xf32>
    %15 = vector.extract_strided_slice %10 {offsets = [8, 0], sizes = [2, 128], strides = [1, 1]} : vector<16x128xf32> to vector<2x128xf32>
    %16 = vector.extract_strided_slice %10 {offsets = [10, 0], sizes = [2, 128], strides = [1, 1]} : vector<16x128xf32> to vector<2x128xf32>
    %17 = vector.extract_strided_slice %10 {offsets = [12, 0], sizes = [2, 128], strides = [1, 1]} : vector<16x128xf32> to vector<2x128xf32>
    %18 = vector.extract_strided_slice %10 {offsets = [14, 0], sizes = [2, 128], strides = [1, 1]} : vector<16x128xf32> to vector<2x128xf32>
    %cst_15 = arith.constant 0.000000e+00 : f32
    %19 = vector.broadcast %cst_15 : f32 to vector<2x32xf32>
    %cst_16 = arith.constant 0.000000e+00 : f32
    %20 = vector.broadcast %cst_16 : f32 to vector<2x32xf32>
    %cst_17 = arith.constant 0.000000e+00 : f32
    %21 = vector.broadcast %cst_17 : f32 to vector<2x32xf32>
    %cst_18 = arith.constant 0.000000e+00 : f32
    %22 = vector.broadcast %cst_18 : f32 to vector<2x32xf32>
    %cst_19 = arith.constant dense<0.000000e+00> : vector<2x128xf32>
    %23 = tpu.matmul %19, %1, %cst_19 {dimension_numbers = #tpu.dot_dimension_numbers<[1], [0], [0], [1], [0, 0, 1, 1], [], []>} : vector<2x32xf32>, vector<32x128xf32>, vector<2x128xf32> -> vector<2x128xf32>
    %24 = arith.addf %11, %23 : vector<2x128xf32>
    %25 = arith.negf %24 : vector<2x128xf32>
    %26 = math.exp %25 : vector<2x128xf32>
    %cst_20 = arith.constant 1.000000e+00 : f32
    %27 = vector.broadcast %cst_20 : f32 to vector<2x128xf32>
    %28 = arith.addf %27, %26 : vector<2x128xf32>
    %29 = arith.divf %27, %28 : vector<2x128xf32>
    %30 = vector.extract_strided_slice %29 {offsets = [0, 0], sizes = [2, 32], strides = [1, 1]} : vector<2x128xf32> to vector<2x32xf32>
    %31 = vector.extract_strided_slice %29 {offsets = [0, 32], sizes = [2, 32], strides = [1, 1]} : vector<2x128xf32> to vector<2x32xf32>
    %32 = vector.extract_strided_slice %29 {offsets = [0, 96], sizes = [2, 32], strides = [1, 1]} : vector<2x128xf32> to vector<2x32xf32>
    %33 = vector.extract_strided_slice %24 {offsets = [0, 64], sizes = [2, 32], strides = [1, 1]} : vector<2x128xf32> to vector<2x32xf32>
    %34 = math.tanh %33 : vector<2x32xf32>
    %35 = arith.mulf %31, %21 : vector<2x32xf32>
    %36 = arith.mulf %30, %34 : vector<2x32xf32>
    %37 = arith.addf %35, %36 : vector<2x32xf32>
    %38 = math.tanh %37 : vector<2x32xf32>
    %39 = arith.mulf %32, %38 : vector<2x32xf32>
    %cst_21 = arith.constant dense<0.000000e+00> : vector<2x128xf32>
    %40 = tpu.matmul %39, %1, %cst_21 {dimension_numbers = #tpu.dot_dimension_numbers<[1], [0], [0], [1], [0, 0, 1, 1], [], []>} : vector<2x32xf32>, vector<32x128xf32>, vector<2x128xf32> -> vector<2x128xf32>
    %41 = arith.addf %12, %40 : vector<2x128xf32>
    %42 = arith.negf %41 : vector<2x128xf32>
    %43 = math.exp %42 : vector<2x128xf32>
    %cst_22 = arith.constant 1.000000e+00 : f32
    %44 = vector.broadcast %cst_22 : f32 to vector<2x128xf32>
    %45 = arith.addf %44, %43 : vector<2x128xf32>
    %46 = arith.divf %44, %45 : vector<2x128xf32>
    %47 = vector.extract_strided_slice %46 {offsets = [0, 0], sizes = [2, 32], strides = [1, 1]} : vector<2x128xf32> to vector<2x32xf32>
    %48 = vector.extract_strided_slice %46 {offsets = [0, 32], sizes = [2, 32], strides = [1, 1]} : vector<2x128xf32> to vector<2x32xf32>
    %49 = vector.extract_strided_slice %46 {offsets = [0, 96], sizes = [2, 32], strides = [1, 1]} : vector<2x128xf32> to vector<2x32xf32>
    %50 = vector.extract_strided_slice %41 {offsets = [0, 64], sizes = [2, 32], strides = [1, 1]} : vector<2x128xf32> to vector<2x32xf32>
    %51 = math.tanh %50 : vector<2x32xf32>
    %52 = arith.mulf %48, %37 : vector<2x32xf32>
    %53 = arith.mulf %47, %51 : vector<2x32xf32>
    %54 = arith.addf %52, %53 : vector<2x32xf32>
    %55 = math.tanh %54 : vector<2x32xf32>
    %56 = arith.mulf %49, %55 : vector<2x32xf32>
    %57 = tpu.concatenate %39, %20 in 1 : vector<2x32xf32>, vector<2x32xf32> -> vector<2x64xf32>
    %cst_23 = arith.constant dense<0.000000e+00> : vector<2x128xf32>
    %58 = tpu.matmul %57, %3, %cst_23 {dimension_numbers = #tpu.dot_dimension_numbers<[1], [0], [0], [1], [0, 0, 1, 1], [], []>} : vector<2x64xf32>, vector<64x128xf32>, vector<2x128xf32> -> vector<2x128xf32>
    %59 = vector.broadcast %4 : vector<1x128xf32> to vector<2x128xf32>
    %60 = arith.addf %58, %59 : vector<2x128xf32>
    %61 = arith.negf %60 : vector<2x128xf32>
    %62 = math.exp %61 : vector<2x128xf32>
    %cst_24 = arith.constant 1.000000e+00 : f32
    %63 = vector.broadcast %cst_24 : f32 to vector<2x128xf32>
    %64 = arith.addf %63, %62 : vector<2x128xf32>
    %65 = arith.divf %63, %64 : vector<2x128xf32>
    %66 = vector.extract_strided_slice %65 {offsets = [0, 0], sizes = [2, 32], strides = [1, 1]} : vector<2x128xf32> to vector<2x32xf32>
    %67 = vector.extract_strided_slice %65 {offsets = [0, 32], sizes = [2, 32], strides = [1, 1]} : vector<2x128xf32> to vector<2x32xf32>
    %68 = vector.extract_strided_slice %65 {offsets = [0, 96], sizes = [2, 32], strides = [1, 1]} : vector<2x128xf32> to vector<2x32xf32>
    %69 = vector.extract_strided_slice %60 {offsets = [0, 64], sizes = [2, 32], strides = [1, 1]} : vector<2x128xf32> to vector<2x32xf32>
    %70 = math.tanh %69 : vector<2x32xf32>
    %71 = arith.mulf %67, %22 : vector<2x32xf32>
    %72 = arith.mulf %66, %70 : vector<2x32xf32>
    %73 = arith.addf %71, %72 : vector<2x32xf32>
    %74 = math.tanh %73 : vector<2x32xf32>
    %75 = arith.mulf %68, %74 : vector<2x32xf32>
    %cst_25 = arith.constant dense<0.000000e+00> : vector<2x128xf32>
    %76 = tpu.matmul %56, %1, %cst_25 {dimension_numbers = #tpu.dot_dimension_numbers<[1], [0], [0], [1], [0, 0, 1, 1], [], []>} : vector<2x32xf32>, vector<32x128xf32>, vector<2x128xf32> -> vector<2x128xf32>
    %77 = arith.addf %13, %76 : vector<2x128xf32>
    %78 = arith.negf %77 : vector<2x128xf32>
    %79 = math.exp %78 : vector<2x128xf32>
    %cst_26 = arith.constant 1.000000e+00 : f32
    %80 = vector.broadcast %cst_26 : f32 to vector<2x128xf32>
    %81 = arith.addf %80, %79 : vector<2x128xf32>
    %82 = arith.divf %80, %81 : vector<2x128xf32>
    %83 = vector.extract_strided_slice %82 {offsets = [0, 0], sizes = [2, 32], strides = [1, 1]} : vector<2x128xf32> to vector<2x32xf32>
    %84 = vector.extract_strided_slice %82 {offsets = [0, 32], sizes = [2, 32], strides = [1, 1]} : vector<2x128xf32> to vector<2x32xf32>
    %85 = vector.extract_strided_slice %82 {offsets = [0, 96], sizes = [2, 32], strides = [1, 1]} : vector<2x128xf32> to vector<2x32xf32>
    %86 = vector.extract_strided_slice %77 {offsets = [0, 64], sizes = [2, 32], strides = [1, 1]} : vector<2x128xf32> to vector<2x32xf32>
    %87 = math.tanh %86 : vector<2x32xf32>
    %88 = arith.mulf %84, %54 : vector<2x32xf32>
    %89 = arith.mulf %83, %87 : vector<2x32xf32>
    %90 = arith.addf %88, %89 : vector<2x32xf32>
    %91 = math.tanh %90 : vector<2x32xf32>
    %92 = arith.mulf %85, %91 : vector<2x32xf32>
    %93 = tpu.concatenate %56, %75 in 1 : vector<2x32xf32>, vector<2x32xf32> -> vector<2x64xf32>
    %cst_27 = arith.constant dense<0.000000e+00> : vector<2x128xf32>
    %94 = tpu.matmul %93, %3, %cst_27 {dimension_numbers = #tpu.dot_dimension_numbers<[1], [0], [0], [1], [0, 0, 1, 1], [], []>} : vector<2x64xf32>, vector<64x128xf32>, vector<2x128xf32> -> vector<2x128xf32>
    %95 = vector.broadcast %4 : vector<1x128xf32> to vector<2x128xf32>
    %96 = arith.addf %94, %95 : vector<2x128xf32>
    %97 = arith.negf %96 : vector<2x128xf32>
    %98 = math.exp %97 : vector<2x128xf32>
    %cst_28 = arith.constant 1.000000e+00 : f32
    %99 = vector.broadcast %cst_28 : f32 to vector<2x128xf32>
    %100 = arith.addf %99, %98 : vector<2x128xf32>
    %101 = arith.divf %99, %100 : vector<2x128xf32>
    %102 = vector.extract_strided_slice %101 {offsets = [0, 0], sizes = [2, 32], strides = [1, 1]} : vector<2x128xf32> to vector<2x32xf32>
    %103 = vector.extract_strided_slice %101 {offsets = [0, 32], sizes = [2, 32], strides = [1, 1]} : vector<2x128xf32> to vector<2x32xf32>
    %104 = vector.extract_strided_slice %101 {offsets = [0, 96], sizes = [2, 32], strides = [1, 1]} : vector<2x128xf32> to vector<2x32xf32>
    %105 = vector.extract_strided_slice %96 {offsets = [0, 64], sizes = [2, 32], strides = [1, 1]} : vector<2x128xf32> to vector<2x32xf32>
    %106 = math.tanh %105 : vector<2x32xf32>
    %107 = arith.mulf %103, %73 : vector<2x32xf32>
    %108 = arith.mulf %102, %106 : vector<2x32xf32>
    %109 = arith.addf %107, %108 : vector<2x32xf32>
    %110 = math.tanh %109 : vector<2x32xf32>
    %111 = arith.mulf %104, %110 : vector<2x32xf32>
    %cst_29 = arith.constant dense<0.000000e+00> : vector<2x128xf32>
    %112 = tpu.matmul %92, %1, %cst_29 {dimension_numbers = #tpu.dot_dimension_numbers<[1], [0], [0], [1], [0, 0, 1, 1], [], []>} : vector<2x32xf32>, vector<32x128xf32>, vector<2x128xf32> -> vector<2x128xf32>
    %113 = arith.addf %14, %112 : vector<2x128xf32>
    %114 = arith.negf %113 : vector<2x128xf32>
    %115 = math.exp %114 : vector<2x128xf32>
    %cst_30 = arith.constant 1.000000e+00 : f32
    %116 = vector.broadcast %cst_30 : f32 to vector<2x128xf32>
    %117 = arith.addf %116, %115 : vector<2x128xf32>
    %118 = arith.divf %116, %117 : vector<2x128xf32>
    %119 = vector.extract_strided_slice %118 {offsets = [0, 0], sizes = [2, 32], strides = [1, 1]} : vector<2x128xf32> to vector<2x32xf32>
    %120 = vector.extract_strided_slice %118 {offsets = [0, 32], sizes = [2, 32], strides = [1, 1]} : vector<2x128xf32> to vector<2x32xf32>
    %121 = vector.extract_strided_slice %118 {offsets = [0, 96], sizes = [2, 32], strides = [1, 1]} : vector<2x128xf32> to vector<2x32xf32>
    %122 = vector.extract_strided_slice %113 {offsets = [0, 64], sizes = [2, 32], strides = [1, 1]} : vector<2x128xf32> to vector<2x32xf32>
    %123 = math.tanh %122 : vector<2x32xf32>
    %124 = arith.mulf %120, %90 : vector<2x32xf32>
    %125 = arith.mulf %119, %123 : vector<2x32xf32>
    %126 = arith.addf %124, %125 : vector<2x32xf32>
    %127 = math.tanh %126 : vector<2x32xf32>
    %128 = arith.mulf %121, %127 : vector<2x32xf32>
    %129 = tpu.concatenate %92, %111 in 1 : vector<2x32xf32>, vector<2x32xf32> -> vector<2x64xf32>
    %cst_31 = arith.constant dense<0.000000e+00> : vector<2x128xf32>
    %130 = tpu.matmul %129, %3, %cst_31 {dimension_numbers = #tpu.dot_dimension_numbers<[1], [0], [0], [1], [0, 0, 1, 1], [], []>} : vector<2x64xf32>, vector<64x128xf32>, vector<2x128xf32> -> vector<2x128xf32>
    %131 = vector.broadcast %4 : vector<1x128xf32> to vector<2x128xf32>
    %132 = arith.addf %130, %131 : vector<2x128xf32>
    %133 = arith.negf %132 : vector<2x128xf32>
    %134 = math.exp %133 : vector<2x128xf32>
    %cst_32 = arith.constant 1.000000e+00 : f32
    %135 = vector.broadcast %cst_32 : f32 to vector<2x128xf32>
    %136 = arith.addf %135, %134 : vector<2x128xf32>
    %137 = arith.divf %135, %136 : vector<2x128xf32>
    %138 = vector.extract_strided_slice %137 {offsets = [0, 0], sizes = [2, 32], strides = [1, 1]} : vector<2x128xf32> to vector<2x32xf32>
    %139 = vector.extract_strided_slice %137 {offsets = [0, 32], sizes = [2, 32], strides = [1, 1]} : vector<2x128xf32> to vector<2x32xf32>
    %140 = vector.extract_strided_slice %137 {offsets = [0, 96], sizes = [2, 32], strides = [1, 1]} : vector<2x128xf32> to vector<2x32xf32>
    %141 = vector.extract_strided_slice %132 {offsets = [0, 64], sizes = [2, 32], strides = [1, 1]} : vector<2x128xf32> to vector<2x32xf32>
    %142 = math.tanh %141 : vector<2x32xf32>
    %143 = arith.mulf %139, %109 : vector<2x32xf32>
    %144 = arith.mulf %138, %142 : vector<2x32xf32>
    %145 = arith.addf %143, %144 : vector<2x32xf32>
    %146 = math.tanh %145 : vector<2x32xf32>
    %147 = arith.mulf %140, %146 : vector<2x32xf32>
    %cst_33 = arith.constant dense<0.000000e+00> : vector<2x128xf32>
    %148 = tpu.matmul %128, %1, %cst_33 {dimension_numbers = #tpu.dot_dimension_numbers<[1], [0], [0], [1], [0, 0, 1, 1], [], []>} : vector<2x32xf32>, vector<32x128xf32>, vector<2x128xf32> -> vector<2x128xf32>
    %149 = arith.addf %15, %148 : vector<2x128xf32>
    %150 = arith.negf %149 : vector<2x128xf32>
    %151 = math.exp %150 : vector<2x128xf32>
    %cst_34 = arith.constant 1.000000e+00 : f32
    %152 = vector.broadcast %cst_34 : f32 to vector<2x128xf32>
    %153 = arith.addf %152, %151 : vector<2x128xf32>
    %154 = arith.divf %152, %153 : vector<2x128xf32>
    %155 = vector.extract_strided_slice %154 {offsets = [0, 0], sizes = [2, 32], strides = [1, 1]} : vector<2x128xf32> to vector<2x32xf32>
    %156 = vector.extract_strided_slice %154 {offsets = [0, 32], sizes = [2, 32], strides = [1, 1]} : vector<2x128xf32> to vector<2x32xf32>
    %157 = vector.extract_strided_slice %154 {offsets = [0, 96], sizes = [2, 32], strides = [1, 1]} : vector<2x128xf32> to vector<2x32xf32>
    %158 = vector.extract_strided_slice %149 {offsets = [0, 64], sizes = [2, 32], strides = [1, 1]} : vector<2x128xf32> to vector<2x32xf32>
    %159 = math.tanh %158 : vector<2x32xf32>
    %160 = arith.mulf %156, %126 : vector<2x32xf32>
    %161 = arith.mulf %155, %159 : vector<2x32xf32>
    %162 = arith.addf %160, %161 : vector<2x32xf32>
    %163 = math.tanh %162 : vector<2x32xf32>
    %164 = arith.mulf %157, %163 : vector<2x32xf32>
    %165 = tpu.concatenate %128, %147 in 1 : vector<2x32xf32>, vector<2x32xf32> -> vector<2x64xf32>
    %cst_35 = arith.constant dense<0.000000e+00> : vector<2x128xf32>
    %166 = tpu.matmul %165, %3, %cst_35 {dimension_numbers = #tpu.dot_dimension_numbers<[1], [0], [0], [1], [0, 0, 1, 1], [], []>} : vector<2x64xf32>, vector<64x128xf32>, vector<2x128xf32> -> vector<2x128xf32>
    %167 = vector.broadcast %4 : vector<1x128xf32> to vector<2x128xf32>
    %168 = arith.addf %166, %167 : vector<2x128xf32>
    %169 = arith.negf %168 : vector<2x128xf32>
    %170 = math.exp %169 : vector<2x128xf32>
    %cst_36 = arith.constant 1.000000e+00 : f32
    %171 = vector.broadcast %cst_36 : f32 to vector<2x128xf32>
    %172 = arith.addf %171, %170 : vector<2x128xf32>
    %173 = arith.divf %171, %172 : vector<2x128xf32>
    %174 = vector.extract_strided_slice %173 {offsets = [0, 0], sizes = [2, 32], strides = [1, 1]} : vector<2x128xf32> to vector<2x32xf32>
    %175 = vector.extract_strided_slice %173 {offsets = [0, 32], sizes = [2, 32], strides = [1, 1]} : vector<2x128xf32> to vector<2x32xf32>
    %176 = vector.extract_strided_slice %173 {offsets = [0, 96], sizes = [2, 32], strides = [1, 1]} : vector<2x128xf32> to vector<2x32xf32>
    %177 = vector.extract_strided_slice %168 {offsets = [0, 64], sizes = [2, 32], strides = [1, 1]} : vector<2x128xf32> to vector<2x32xf32>
    %178 = math.tanh %177 : vector<2x32xf32>
    %179 = arith.mulf %175, %145 : vector<2x32xf32>
    %180 = arith.mulf %174, %178 : vector<2x32xf32>
    %181 = arith.addf %179, %180 : vector<2x32xf32>
    %182 = math.tanh %181 : vector<2x32xf32>
    %183 = arith.mulf %176, %182 : vector<2x32xf32>
    %cst_37 = arith.constant dense<0.000000e+00> : vector<2x128xf32>
    %184 = tpu.matmul %164, %1, %cst_37 {dimension_numbers = #tpu.dot_dimension_numbers<[1], [0], [0], [1], [0, 0, 1, 1], [], []>} : vector<2x32xf32>, vector<32x128xf32>, vector<2x128xf32> -> vector<2x128xf32>
    %185 = arith.addf %16, %184 : vector<2x128xf32>
    %186 = arith.negf %185 : vector<2x128xf32>
    %187 = math.exp %186 : vector<2x128xf32>
    %cst_38 = arith.constant 1.000000e+00 : f32
    %188 = vector.broadcast %cst_38 : f32 to vector<2x128xf32>
    %189 = arith.addf %188, %187 : vector<2x128xf32>
    %190 = arith.divf %188, %189 : vector<2x128xf32>
    %191 = vector.extract_strided_slice %190 {offsets = [0, 0], sizes = [2, 32], strides = [1, 1]} : vector<2x128xf32> to vector<2x32xf32>
    %192 = vector.extract_strided_slice %190 {offsets = [0, 32], sizes = [2, 32], strides = [1, 1]} : vector<2x128xf32> to vector<2x32xf32>
    %193 = vector.extract_strided_slice %190 {offsets = [0, 96], sizes = [2, 32], strides = [1, 1]} : vector<2x128xf32> to vector<2x32xf32>
    %194 = vector.extract_strided_slice %185 {offsets = [0, 64], sizes = [2, 32], strides = [1, 1]} : vector<2x128xf32> to vector<2x32xf32>
    %195 = math.tanh %194 : vector<2x32xf32>
    %196 = arith.mulf %192, %162 : vector<2x32xf32>
    %197 = arith.mulf %191, %195 : vector<2x32xf32>
    %198 = arith.addf %196, %197 : vector<2x32xf32>
    %199 = math.tanh %198 : vector<2x32xf32>
    %200 = arith.mulf %193, %199 : vector<2x32xf32>
    %201 = tpu.concatenate %164, %183 in 1 : vector<2x32xf32>, vector<2x32xf32> -> vector<2x64xf32>
    %cst_39 = arith.constant dense<0.000000e+00> : vector<2x128xf32>
    %202 = tpu.matmul %201, %3, %cst_39 {dimension_numbers = #tpu.dot_dimension_numbers<[1], [0], [0], [1], [0, 0, 1, 1], [], []>} : vector<2x64xf32>, vector<64x128xf32>, vector<2x128xf32> -> vector<2x128xf32>
    %203 = vector.broadcast %4 : vector<1x128xf32> to vector<2x128xf32>
    %204 = arith.addf %202, %203 : vector<2x128xf32>
    %205 = arith.negf %204 : vector<2x128xf32>
    %206 = math.exp %205 : vector<2x128xf32>
    %cst_40 = arith.constant 1.000000e+00 : f32
    %207 = vector.broadcast %cst_40 : f32 to vector<2x128xf32>
    %208 = arith.addf %207, %206 : vector<2x128xf32>
    %209 = arith.divf %207, %208 : vector<2x128xf32>
    %210 = vector.extract_strided_slice %209 {offsets = [0, 0], sizes = [2, 32], strides = [1, 1]} : vector<2x128xf32> to vector<2x32xf32>
    %211 = vector.extract_strided_slice %209 {offsets = [0, 32], sizes = [2, 32], strides = [1, 1]} : vector<2x128xf32> to vector<2x32xf32>
    %212 = vector.extract_strided_slice %209 {offsets = [0, 96], sizes = [2, 32], strides = [1, 1]} : vector<2x128xf32> to vector<2x32xf32>
    %213 = vector.extract_strided_slice %204 {offsets = [0, 64], sizes = [2, 32], strides = [1, 1]} : vector<2x128xf32> to vector<2x32xf32>
    %214 = math.tanh %213 : vector<2x32xf32>
    %215 = arith.mulf %211, %181 : vector<2x32xf32>
    %216 = arith.mulf %210, %214 : vector<2x32xf32>
    %217 = arith.addf %215, %216 : vector<2x32xf32>
    %218 = math.tanh %217 : vector<2x32xf32>
    %219 = arith.mulf %212, %218 : vector<2x32xf32>
    %cst_41 = arith.constant dense<0.000000e+00> : vector<2x128xf32>
    %220 = tpu.matmul %200, %1, %cst_41 {dimension_numbers = #tpu.dot_dimension_numbers<[1], [0], [0], [1], [0, 0, 1, 1], [], []>} : vector<2x32xf32>, vector<32x128xf32>, vector<2x128xf32> -> vector<2x128xf32>
    %221 = arith.addf %17, %220 : vector<2x128xf32>
    %222 = arith.negf %221 : vector<2x128xf32>
    %223 = math.exp %222 : vector<2x128xf32>
    %cst_42 = arith.constant 1.000000e+00 : f32
    %224 = vector.broadcast %cst_42 : f32 to vector<2x128xf32>
    %225 = arith.addf %224, %223 : vector<2x128xf32>
    %226 = arith.divf %224, %225 : vector<2x128xf32>
    %227 = vector.extract_strided_slice %226 {offsets = [0, 0], sizes = [2, 32], strides = [1, 1]} : vector<2x128xf32> to vector<2x32xf32>
    %228 = vector.extract_strided_slice %226 {offsets = [0, 32], sizes = [2, 32], strides = [1, 1]} : vector<2x128xf32> to vector<2x32xf32>
    %229 = vector.extract_strided_slice %226 {offsets = [0, 96], sizes = [2, 32], strides = [1, 1]} : vector<2x128xf32> to vector<2x32xf32>
    %230 = vector.extract_strided_slice %221 {offsets = [0, 64], sizes = [2, 32], strides = [1, 1]} : vector<2x128xf32> to vector<2x32xf32>
    %231 = math.tanh %230 : vector<2x32xf32>
    %232 = arith.mulf %228, %198 : vector<2x32xf32>
    %233 = arith.mulf %227, %231 : vector<2x32xf32>
    %234 = arith.addf %232, %233 : vector<2x32xf32>
    %235 = math.tanh %234 : vector<2x32xf32>
    %236 = arith.mulf %229, %235 : vector<2x32xf32>
    %237 = tpu.concatenate %200, %219 in 1 : vector<2x32xf32>, vector<2x32xf32> -> vector<2x64xf32>
    %cst_43 = arith.constant dense<0.000000e+00> : vector<2x128xf32>
    %238 = tpu.matmul %237, %3, %cst_43 {dimension_numbers = #tpu.dot_dimension_numbers<[1], [0], [0], [1], [0, 0, 1, 1], [], []>} : vector<2x64xf32>, vector<64x128xf32>, vector<2x128xf32> -> vector<2x128xf32>
    %239 = vector.broadcast %4 : vector<1x128xf32> to vector<2x128xf32>
    %240 = arith.addf %238, %239 : vector<2x128xf32>
    %241 = arith.negf %240 : vector<2x128xf32>
    %242 = math.exp %241 : vector<2x128xf32>
    %cst_44 = arith.constant 1.000000e+00 : f32
    %243 = vector.broadcast %cst_44 : f32 to vector<2x128xf32>
    %244 = arith.addf %243, %242 : vector<2x128xf32>
    %245 = arith.divf %243, %244 : vector<2x128xf32>
    %246 = vector.extract_strided_slice %245 {offsets = [0, 0], sizes = [2, 32], strides = [1, 1]} : vector<2x128xf32> to vector<2x32xf32>
    %247 = vector.extract_strided_slice %245 {offsets = [0, 32], sizes = [2, 32], strides = [1, 1]} : vector<2x128xf32> to vector<2x32xf32>
    %248 = vector.extract_strided_slice %245 {offsets = [0, 96], sizes = [2, 32], strides = [1, 1]} : vector<2x128xf32> to vector<2x32xf32>
    %249 = vector.extract_strided_slice %240 {offsets = [0, 64], sizes = [2, 32], strides = [1, 1]} : vector<2x128xf32> to vector<2x32xf32>
    %250 = math.tanh %249 : vector<2x32xf32>
    %251 = arith.mulf %247, %217 : vector<2x32xf32>
    %252 = arith.mulf %246, %250 : vector<2x32xf32>
    %253 = arith.addf %251, %252 : vector<2x32xf32>
    %254 = math.tanh %253 : vector<2x32xf32>
    %255 = arith.mulf %248, %254 : vector<2x32xf32>
    %cst_45 = arith.constant dense<0.000000e+00> : vector<2x128xf32>
    %256 = tpu.matmul %236, %1, %cst_45 {dimension_numbers = #tpu.dot_dimension_numbers<[1], [0], [0], [1], [0, 0, 1, 1], [], []>} : vector<2x32xf32>, vector<32x128xf32>, vector<2x128xf32> -> vector<2x128xf32>
    %257 = arith.addf %18, %256 : vector<2x128xf32>
    %258 = arith.negf %257 : vector<2x128xf32>
    %259 = math.exp %258 : vector<2x128xf32>
    %cst_46 = arith.constant 1.000000e+00 : f32
    %260 = vector.broadcast %cst_46 : f32 to vector<2x128xf32>
    %261 = arith.addf %260, %259 : vector<2x128xf32>
    %262 = arith.divf %260, %261 : vector<2x128xf32>
    %263 = vector.extract_strided_slice %262 {offsets = [0, 0], sizes = [2, 32], strides = [1, 1]} : vector<2x128xf32> to vector<2x32xf32>
    %264 = vector.extract_strided_slice %262 {offsets = [0, 32], sizes = [2, 32], strides = [1, 1]} : vector<2x128xf32> to vector<2x32xf32>
    %265 = vector.extract_strided_slice %262 {offsets = [0, 96], sizes = [2, 32], strides = [1, 1]} : vector<2x128xf32> to vector<2x32xf32>
    %266 = vector.extract_strided_slice %257 {offsets = [0, 64], sizes = [2, 32], strides = [1, 1]} : vector<2x128xf32> to vector<2x32xf32>
    %267 = math.tanh %266 : vector<2x32xf32>
    %268 = arith.mulf %264, %234 : vector<2x32xf32>
    %269 = arith.mulf %263, %267 : vector<2x32xf32>
    %270 = arith.addf %268, %269 : vector<2x32xf32>
    %271 = math.tanh %270 : vector<2x32xf32>
    %272 = arith.mulf %265, %271 : vector<2x32xf32>
    %273 = tpu.concatenate %236, %255 in 1 : vector<2x32xf32>, vector<2x32xf32> -> vector<2x64xf32>
    %cst_47 = arith.constant dense<0.000000e+00> : vector<2x128xf32>
    %274 = tpu.matmul %273, %3, %cst_47 {dimension_numbers = #tpu.dot_dimension_numbers<[1], [0], [0], [1], [0, 0, 1, 1], [], []>} : vector<2x64xf32>, vector<64x128xf32>, vector<2x128xf32> -> vector<2x128xf32>
    %275 = vector.broadcast %4 : vector<1x128xf32> to vector<2x128xf32>
    %276 = arith.addf %274, %275 : vector<2x128xf32>
    %277 = arith.negf %276 : vector<2x128xf32>
    %278 = math.exp %277 : vector<2x128xf32>
    %cst_48 = arith.constant 1.000000e+00 : f32
    %279 = vector.broadcast %cst_48 : f32 to vector<2x128xf32>
    %280 = arith.addf %279, %278 : vector<2x128xf32>
    %281 = arith.divf %279, %280 : vector<2x128xf32>
    %282 = vector.extract_strided_slice %281 {offsets = [0, 0], sizes = [2, 32], strides = [1, 1]} : vector<2x128xf32> to vector<2x32xf32>
    %283 = vector.extract_strided_slice %281 {offsets = [0, 32], sizes = [2, 32], strides = [1, 1]} : vector<2x128xf32> to vector<2x32xf32>
    %284 = vector.extract_strided_slice %281 {offsets = [0, 96], sizes = [2, 32], strides = [1, 1]} : vector<2x128xf32> to vector<2x32xf32>
    %285 = vector.extract_strided_slice %276 {offsets = [0, 64], sizes = [2, 32], strides = [1, 1]} : vector<2x128xf32> to vector<2x32xf32>
    %286 = math.tanh %285 : vector<2x32xf32>
    %287 = arith.mulf %283, %253 : vector<2x32xf32>
    %288 = arith.mulf %282, %286 : vector<2x32xf32>
    %289 = arith.addf %287, %288 : vector<2x32xf32>
    %290 = math.tanh %289 : vector<2x32xf32>
    %291 = arith.mulf %284, %290 : vector<2x32xf32>
    %292 = tpu.concatenate %272, %291 in 1 : vector<2x32xf32>, vector<2x32xf32> -> vector<2x64xf32>
    %cst_49 = arith.constant dense<0.000000e+00> : vector<2x128xf32>
    %293 = tpu.matmul %292, %3, %cst_49 {dimension_numbers = #tpu.dot_dimension_numbers<[1], [0], [0], [1], [0, 0, 1, 1], [], []>} : vector<2x64xf32>, vector<64x128xf32>, vector<2x128xf32> -> vector<2x128xf32>
    %294 = vector.broadcast %4 : vector<1x128xf32> to vector<2x128xf32>
    %295 = arith.addf %293, %294 : vector<2x128xf32>
    %296 = arith.negf %295 : vector<2x128xf32>
    %297 = math.exp %296 : vector<2x128xf32>
    %cst_50 = arith.constant 1.000000e+00 : f32
    %298 = vector.broadcast %cst_50 : f32 to vector<2x128xf32>
    %299 = arith.addf %298, %297 : vector<2x128xf32>
    %300 = arith.divf %298, %299 : vector<2x128xf32>
    %301 = vector.extract_strided_slice %300 {offsets = [0, 0], sizes = [2, 32], strides = [1, 1]} : vector<2x128xf32> to vector<2x32xf32>
    %302 = vector.extract_strided_slice %300 {offsets = [0, 32], sizes = [2, 32], strides = [1, 1]} : vector<2x128xf32> to vector<2x32xf32>
    %303 = vector.extract_strided_slice %300 {offsets = [0, 96], sizes = [2, 32], strides = [1, 1]} : vector<2x128xf32> to vector<2x32xf32>
    %304 = vector.extract_strided_slice %295 {offsets = [0, 64], sizes = [2, 32], strides = [1, 1]} : vector<2x128xf32> to vector<2x32xf32>
    %305 = math.tanh %304 : vector<2x32xf32>
    %306 = arith.mulf %302, %289 : vector<2x32xf32>
    %307 = arith.mulf %301, %305 : vector<2x32xf32>
    %308 = arith.addf %306, %307 : vector<2x32xf32>
    %309 = math.tanh %308 : vector<2x32xf32>
    %310 = arith.mulf %303, %309 : vector<2x32xf32>
    %cst_51 = arith.constant dense<0.000000e+00> : vector<2x128xf32>
    %311 = tpu.matmul %310, %5, %cst_51 {dimension_numbers = #tpu.dot_dimension_numbers<[1], [0], [0], [1], [0, 0, 1, 1], [], []>} : vector<2x32xf32>, vector<32x128xf32>, vector<2x128xf32> -> vector<2x128xf32>
    %312 = vector.broadcast %6 : vector<1x128xf32> to vector<2x128xf32>
    %313 = arith.addf %311, %312 : vector<2x128xf32>
    %314 = arith.negf %313 : vector<2x128xf32>
    %315 = math.exp %314 : vector<2x128xf32>
    %cst_52 = arith.constant 1.000000e+00 : f32
    %316 = vector.broadcast %cst_52 : f32 to vector<2x128xf32>
    %317 = arith.addf %316, %315 : vector<2x128xf32>
    %318 = arith.divf %316, %317 : vector<2x128xf32>
    %c0_53 = arith.constant 0 : index
    %c0_54 = arith.constant 0 : index
    %319 = vector.load %arg8[%c0_53, %c0_54] : memref<2x128xf32, #tpu.memory_space<vmem>>, vector<2x128xf32>
    tpu.vector_store %arg8[%c0_53, %c0_54], %318 {strides = array<i32>} : memref<2x128xf32, #tpu.memory_space<vmem>>, vector<2x128xf32>,
    return
  }
}

</mosaic_0001>

<bundles_post_ra>
// kernel: lstm_net_forward.1
= control target key start
LH: loop header
LB: loop body
LE: loop exit
PB: predicated region body
PF: predicated region fallthrough
CT: control target
= control target key end

     0   :  { %vm58_vm0 = vcmask 64512   ;;  %v2663_v3 = vmov 0.0|0.0   ;;  %s3104_s0 = inlined_call_operand.vmem [shape: f32[16,8], index: 0, kind: input, shape index: {}]   ;;  %s3105_s1 = inlined_call_operand.vmem [shape: f32[8,128], index: 1, kind: input, shape index: {}]   ;;  %s3106_s2 = inlined_call_operand.vmem [shape: f32[32,128], index: 2, kind: input, shape index: {}]   ;;  %s3107_s3 = inlined_call_operand.vmem [shape: f32[1,128], index: 3, kind: input, shape index: {}]   ;;  %s3108_s4 = inlined_call_operand.vmem [shape: f32[64,128], index: 4, kind: input, shape index: {}]   ;;  %s3109_s5 = inlined_call_operand.vmem [shape: f32[1,128], index: 5, kind: input, shape index: {}]   ;;  %s3110_s6 = inlined_call_operand.vmem [shape: f32[32,128], index: 6, kind: input, shape index: {}]   ;;  %s3111_s7 = inlined_call_operand.vmem [shape: f32[1,128], index: 7, kind: input, shape index: {}]   ;;  %s3112_s8 = inlined_call_operand.hbm [shape: f32[2,128], index: 8, kind: output, shape index: {}]  }
   0x1   :  { %v31_v0 = vld [vmem:[%s3106_s2] sm:$0xff]  ;;  %v32_v1 = vld [vmem:[%s3106_s2 + $0x8] sm:$0xff]  ;;  %2351 = vmatprep.subr.bf16.mxu1 %v2663_v3  ;;  %v33_v7 = vld [vmem:[%s3106_s2 + $0x10] sm:$0xff] }
   0x2   :  { %v30_v2 = vld [vmem:[%s3105_s1] sm:$0xff]  ;;  %v2724_v4 = vpack.c.bf16 %v32_v1, %v31_v0  ;;  %v51_v6 = vld [vmem:[%s3104_s0 + $0x8] sm:$0xff]  ;;  %v34_v8 = vld [vmem:[%s3106_s2 + $0x18] sm:$0xff] }
   0x3   :  { %2095 = vmatprep.subr.mxu0 %v30_v2  ;;  %v50_v5 = vld [vmem:[%s3104_s0] sm:$0xff] }
   0x4   :  { %2096 = vmatpush3.msra.mxu0 %v30_v2  ;;  %2097 = vmatprep.mubr.msk.f32.mxu0 %vm58_vm0, %v50_v5 }
   0x5   :  { %13 = vsyncpa [#allocation3], 0  ;;  %2353 = vmatpush3.bf16.msra.mxu1 %v2724_v4  ;;  %2098 = vmatmul.mubr.msk.f32.vlgmr.msra.gmra.mrb[0].mxu0 %vm58_vm0, %v51_v6  ;;  %v2739_v9 = vpack.c.bf16 %v34_v8, %v33_v7  ;;  %vm2664_vm1 = vmmov 0   ;;  %v2665_v10 = vmov 0.0   ;;  %v1937_v11 = vld [vmem:[%s3107_s3] ss:$0 sm:$0xff] }
   0x6   :  { %2354 = vmatprep.subr.bf16.mxu1 %v2663_v3  ;;  %2108 = vmatprep.mubr.msk.f32.mxu1 %vm2664_vm1, %v2665_v10  ;;  %s2666_s18 = smov 64   ;;  %s2667_s3 = smov 32   ;;  %v36_v29 = vld [vmem:[%s3108_s4] sm:$0xff]  ;;  %v37_v30 = vld [vmem:[%s3108_s4 + $0x8] sm:$0xff]  ;;  %v38_v31 = vld [vmem:[%s3108_s4 + $0x10] sm:$0xff]  ;;  %vm140_vm2 = vcmask 261120  }
   0x7   :  { %2357 = vmatprep.subr.bf16.mxu0 %v2663_v3  ;;  %2119 = vmatprep.mubr.msk.f32.mxu0 %vm2664_vm1, %v2665_v10  ;;  %v2778_v32 = vpack.c.bf16 %v37_v30, %v36_v29  ;;  %v39_v33 = vld [vmem:[%s3108_s4 + $0x18] sm:$0xff]  ;;  %v40_v35 = vld [vmem:[%s3108_s4 + $0x20] sm:$0xff]  ;;  %v41_v36 = vld [vmem:[%s3108_s4 + $0x28] sm:$0xff]  ;;  %vm353_vm3 = vcmask 523264  }
   0x8   :  { %2359 = vmatpush3.bf16.msra.mxu0 %v2724_v4  ;;  %v2784_v34 = vpack.c.bf16 %v39_v33, %v38_v31  ;;  %v2794_v37 = vpack.c.bf16 %v41_v36, %v40_v35  ;;  %v42_v38 = vld [vmem:[%s3108_s4 + $0x30] sm:$0xff]  ;;  %v43_v39 = vld [vmem:[%s3108_s4 + $0x38] sm:$0xff]  ;;  %v2829_v46 = vld [vmem:[%s3109_s5] ss:$0 sm:$0xff] }
   0x9   :  { %2356 = vmatpush3.bf16.msra.mxu1 %v2739_v9  ;;  %2360 = vmatprep.subr.bf16.mxu0 %v2663_v3  ;;  %v2805_v41 = vpack.c.bf16 %v43_v39, %v42_v38 }
   0xa   :  { %2363 = vmatprep.subr.bf16.mxu1 %v2663_v3 }
   0xc   :  { %2109 = vmatmul.mubr.f32.vlgmr.msra.gmra.mrb[0].mxu1 %v2665_v10  ;;  %2362 = vmatpush3.bf16.msra.mxu0 %v2739_v9 }
   0xd   :  { %2138 = vmatprep.mubr.msk.f32.mxu1 %vm2664_vm1, %v2665_v10  ;;  %2375 = vmatprep.subr.bf16.mxu0 %v2663_v3 }
   0xe   :  { %2365 = vmatpush3.bf16.msra.mxu1 %v2778_v32 }
   0xf   :  { %2366 = vmatprep.subr.bf16.mxu1 %v2663_v3 }
  0x12   :  { %2368 = vmatpush3.bf16.msra.mxu1 %v2784_v34 }
  0x13   :  { %2369 = vmatprep.subr.bf16.mxu1 %v2663_v3 }
  0x16   :  { %2371 = vmatpush3.bf16.msra.mxu1 %v2794_v37 }
  0x17   :  { %2372 = vmatprep.subr.bf16.mxu1 %v2663_v3 }
  0x1a   :  { %2374 = vmatpush3.bf16.msra.mxu1 %v2805_v41 }
  0x1b   :  { %2393 = vmatprep.subr.bf16.mxu1 %v2663_v3 }
  0xd8   :  { %v2099_v12 = vpop.f32.mrb[0].mxu0 }
  0xd9   :  { %v2759_v13 = vadd.f32 %v2099_v12, %v1937_v11  ;;  %v131_v14 = vpop.f32.mrb[1].mxu0 }
  0xda   :  { %v2761_v15 = vadd.f32 %v1937_v11, %v131_v14 }
  0xdf   :  { %v210_v16 = vpop.f32.mrb[0].mxu1 }
  0xe0   :  { %v214_v17 = vadd.f32 %v210_v16, %v2761_v15  ;;  %v2110_v18 = vpop.f32.mrb[1].mxu1 }
  0xe2   :  { %2507 = vtanh.f32 %v214_v17  ;;  %v1940_v20 = vmul.f32 -1.442695, %v214_v17 }
  0xe4   :  { %2509 = vpow2.f32 %v1940_v20 }
  0xec   :  { %v2508_v19 = vpop.eup %2507 }
  0xed   :  { %224 = vrot.lane.b32.xlu0 %v2508_v19, %s2666_s18 }
  0xee   :  { %v2510_v21 = vpop.eup %2509 }
  0xef   :  { %v218_v22 = vadd.f32 1.0, %v2510_v21 }
  0xf1   :  { %2511 = vrcp.f32 %v218_v22 }
  0xfb   :  { %v2512_v23 = vpop.eup %2511 }
  0xfc   :  { %v222_v26 = vmul.f32 0.0, %v2512_v23 }
 0x15f   :  { %v225_v24 = vpop.permute.xlu0 %224 }
 0x160   :  { %v227_v25 = vmul.f32 %v2512_v23, %v225_v24 }
 0x162   :  { %229 = vrot.lane.b32.xlu0 %v227_v25, %s2667_s3 }
 0x1d4   :  { %v230_v27 = vpop.permute.xlu0 %229 }
 0x1d5   :  { %v2766_v28 = vadd.f32 %v230_v27, %v222_v26 }
 0x1d7   :  { %2513 = vtanh.f32 %v2766_v28  ;;  %v326_v6 = vrot.slane %v2766_v28, 6 }
 0x1e1   :  { %v2514_v40 = vpop.eup %2513 }
 0x1e2   :  { %235 = vrot.lane.b32.xlu1 %v2514_v40, %s2666_s18 }
 0x254   :  { %v236_v42 = vpop.permute.xlu1 %235 }
 0x255   :  { %v238_v43 = vmul.f32 %v2512_v23, %v236_v42 }
 0x257   :  { %240 = vrot.lane.b32.xlu1 %v238_v43, %s2667_s3 }
 0x2c9   :  { %v241_v44 = vpop.permute.xlu1 %240 }
 0x2ca   :  { %v346_v45 = vsel %vm140_vm2, %v241_v44, 0.0  ;;  %2120 = vmatmul.mubr.msk.f32.vlgmr.msra.gmra.mrb[2].mxu0 %vm140_vm2, %v241_v44 }
 0x2cb   :  { %2139 = vmatmul.mubr.msk.f32.vlgmr.msra.gmra.mrb[2].mxu1 %vm353_vm3, %v346_v45  ;;  %2377 = vmatpush3.bf16.msra.mxu0 %v2724_v4 }
 0x2cc   :  { %2378 = vmatprep.subr.bf16.mxu0 %v2663_v3  ;;  %2149 = vmatprep.mubr.msk.f32.mxu0 %vm2664_vm1, %v2665_v10 }
 0x2cd   :  { %2395 = vmatpush3.bf16.msra.mxu1 %v2724_v4  ;;  %2179 = vmatprep.mubr.msk.f32.mxu1 %vm2664_vm1, %v2665_v10 }
 0x2ce   :  { %2396 = vmatprep.subr.bf16.mxu1 %v2663_v3 }
 0x2cf   :  { %2380 = vmatpush3.bf16.msra.mxu0 %v2739_v9 }
 0x2d0   :  { %2381 = vmatprep.subr.bf16.mxu0 %v2663_v3 }
 0x2d1   :  { %2398 = vmatpush3.bf16.msra.mxu1 %v2739_v9 }
 0x2d2   :  { %2399 = vmatprep.subr.bf16.mxu1 %v2663_v3 }
 0x39d   :  { %v310_v47 = vpop.f32.mrb[2].mxu0 }
 0x39e   :  { %v315_v48 = vrot.slane %v310_v47, 6  ;;  %v2121_v49 = vpop.f32.mrb[3].mxu0  ;;  %v423_v50 = vpop.f32.mrb[2].mxu1 }
 0x39f   :  { %v424_v51 = vadd.f32 %v2829_v46, %v423_v50  ;;  %v2140_v52 = vpop.f32.mrb[3].mxu1 }
 0x3a0   :  { %v317_v53 = vadd.f32 %v315_v48, %v2761_v15 }
 0x3a1   :  { %2515 = vtanh.f32 %v424_v51  ;;  %v1945_v56 = vmul.f32 -1.442695, %v424_v51 }
 0x3a2   :  { %2517 = vtanh.f32 %v317_v53  ;;  %v1942_v57 = vmul.f32 -1.442695, %v317_v53 }
 0x3a3   :  { %2519 = vpow2.f32 %v1945_v56 }
 0x3a4   :  { %2521 = vpow2.f32 %v1942_v57 }
 0x3ab   :  { %v2516_v54 = vpop.eup %2515 }
 0x3ac   :  { %v2518_v55 = vpop.eup %2517  ;;  %436 = vrot.lane.b32.xlu1 %v2516_v54, %s2666_s18 }
 0x3ad   :  { %330 = vrot.lane.b32.xlu0 %v2518_v55, %s2666_s18  ;;  %v2520_v58 = vpop.eup %2519 }
 0x3ae   :  { %v2522_v59 = vpop.eup %2521  ;;  %v430_v60 = vadd.f32 1.0, %v2520_v58 }
 0x3af   :  { %v321_v61 = vadd.f32 1.0, %v2522_v59 }
 0x3b0   :  { %2523 = vrcp.f32 %v430_v60 }
 0x3b1   :  { %2525 = vrcp.f32 %v321_v61 }
 0x3ba   :  { %v2524_v62 = vpop.eup %2523 }
 0x3bb   :  { %v2526_v0 = vpop.eup %2525  ;;  %v434_v7 = vmul.f32 0.0, %v2524_v62 }
 0x3bc   :  { %v328_v11 = vmul.f32 %v2526_v0, %v326_v6 }
 0x41e   :  { %v437_v63 = vpop.permute.xlu1 %436 }
 0x41f   :  { %v439_v1 = vmul.f32 %v2524_v62, %v437_v63  ;;  %v331_v2 = vpop.permute.xlu0 %330 }
 0x420   :  { %v333_v5 = vmul.f32 %v2526_v0, %v331_v2 }
 0x421   :  { %441 = vrot.lane.b32.xlu1 %v439_v1, %s2667_s3 }
 0x422   :  { %335 = vrot.lane.b32.xlu0 %v333_v5, %s2667_s3 }
 0x493   :  { %v442_v8 = vpop.permute.xlu1 %441 }
 0x494   :  { %v2838_v12 = vadd.f32 %v442_v8, %v434_v7  ;;  %v336_v14 = vpop.permute.xlu0 %335 }
 0x495   :  { %v2840_v16 = vadd.f32 %v336_v14, %v328_v11 }
 0x496   :  { %2527 = vtanh.f32 %v2838_v12 }
 0x497   :  { %2529 = vtanh.f32 %v2840_v16  ;;  %v539_v56 = vrot.slane %v2840_v16, 6 }
 0x4a0   :  { %v2528_v17 = vpop.eup %2527 }
 0x4a1   :  { %v2530_v18 = vpop.eup %2529  ;;  %447 = vrot.lane.b32.xlu1 %v2528_v17, %s2666_s18 }
 0x4a2   :  { %341 = vrot.lane.b32.xlu0 %v2530_v18, %s2666_s18 }
 0x513   :  { %v448_v19 = vpop.permute.xlu1 %447 }
 0x514   :  { %v342_v20 = vpop.permute.xlu0 %341  ;;  %v450_v22 = vmul.f32 %v2524_v62, %v448_v19 }
 0x515   :  { %v344_v21 = vmul.f32 %v2526_v0, %v342_v20 }
 0x516   :  { %v562_v24 = vrot.slane %v450_v22, 6 }
 0x517   :  { %v452_v23 = vrot.slane %v344_v21, 2  ;;  %558 = vrot.lane.b32.xlu1 %v344_v21, %s2667_s3 }
 0x519   :  { %453 = vrot.lane.b32.xlu0 %v452_v23, %s2667_s3 }
 0x51d   :  { %563 = vrot.lane.b32.xlu0 %v562_v24, %s2666_s18 }
 0x589   :  { %v559_v27 = vpop.permute.xlu1 %558 }
 0x58b   :  { %v454_v25 = vpop.permute.xlu0 %453 }
 0x58c   :  { %2150 = vmatmul.mubr.msk.f32.vlgmr.msra.gmra.mrb[4].mxu0 %vm140_vm2, %v454_v25 }
 0x58d   :  { %2383 = vmatpush3.bf16.msra.mxu0 %v2778_v32  ;;  %2168 = vmatprep.mubr.msk.f32.mxu0 %vm2664_vm1, %v2665_v10 }
 0x58e   :  { %2384 = vmatprep.subr.bf16.mxu0 %v2663_v3 }
 0x58f   :  { %v564_v26 = vpop.permute.xlu0 %563 }
 0x590   :  { %v566_v28 = vsel %vm140_vm2, %v559_v27, %v564_v26 }
 0x591   :  { %2386 = vmatpush3.bf16.msra.mxu0 %v2784_v34  ;;  %v568_v29 = vrot.slane %v566_v28, 2 }
 0x592   :  { %2387 = vmatprep.subr.bf16.mxu0 %v2663_v3 }
 0x595   :  { %2389 = vmatpush3.bf16.msra.mxu0 %v2794_v37 }
 0x596   :  { %2390 = vmatprep.subr.bf16.mxu0 %v2663_v3 }
 0x599   :  { %2392 = vmatpush3.bf16.msra.mxu0 %v2805_v41 }
 0x59a   :  { %2411 = vmatprep.subr.bf16.mxu0 %v2663_v3 }
 0x59c   :  { %2169 = vmatmul.mubr.msk.f32.vlgmr.msra.gmra.mrb[6].mxu0 %vm353_vm3, %v568_v29 }
 0x59d   :  { %2413 = vmatpush3.bf16.msra.mxu0 %v2724_v4  ;;  %2209 = vmatprep.mubr.msk.f32.mxu0 %vm2664_vm1, %v2665_v10 }
 0x59e   :  { %2414 = vmatprep.subr.bf16.mxu0 %v2663_v3 }
 0x5a1   :  { %2416 = vmatpush3.bf16.msra.mxu0 %v2739_v9 }
 0x5a2   :  { %2417 = vmatprep.subr.bf16.mxu0 %v2663_v3 }
 0x65f   :  { %v523_v30 = vpop.f32.mrb[4].mxu0 }
 0x660   :  { %v528_v31 = vrot.slane %v523_v30, 4  ;;  %v2151_v33 = vpop.f32.mrb[5].mxu0 }
 0x662   :  { %v530_v35 = vadd.f32 %v528_v31, %v2761_v15 }
 0x664   :  { %2531 = vtanh.f32 %v530_v35  ;;  %v1947_v43 = vmul.f32 -1.442695, %v530_v35 }
 0x66e   :  { %v2532_v36 = vpop.eup %2531 }
 0x66f   :  { %v637_v38 = vpop.f32.mrb[6].mxu0  ;;  %543 = vrot.lane.b32.xlu1 %v2532_v36, %s2666_s18 }
 0x670   :  { %v638_v39 = vadd.f32 %v2829_v46, %v637_v38  ;;  %v2170_v40 = vpop.f32.mrb[7].mxu0 }
 0x672   :  { %2533 = vtanh.f32 %v638_v39  ;;  %v1949_v45 = vmul.f32 -1.442695, %v638_v39 }
 0x673   :  { %2535 = vpow2.f32 %v1947_v43 }
 0x674   :  { %2537 = vpow2.f32 %v1949_v45 }
 0x67c   :  { %v2534_v42 = vpop.eup %2533 }
 0x67d   :  { %650 = vrot.lane.b32.xlu0 %v2534_v42, %s2666_s18  ;;  %v2536_v44 = vpop.eup %2535 }
 0x67e   :  { %v534_v47 = vadd.f32 1.0, %v2536_v44  ;;  %v2538_v48 = vpop.eup %2537 }
 0x67f   :  { %v644_v50 = vadd.f32 1.0, %v2538_v48 }
 0x680   :  { %2539 = vrcp.f32 %v534_v47 }
 0x681   :  { %2541 = vrcp.f32 %v644_v50 }
 0x68a   :  { %v2540_v49 = vpop.eup %2539 }
 0x68b   :  { %v2542_v53 = vpop.eup %2541  ;;  %v541_v57 = vmul.f32 %v2540_v49, %v539_v56 }
 0x68c   :  { %v648_v61 = vmul.f32 %v2542_v53, %v2838_v12 }
 0x6e1   :  { %v544_v51 = vpop.permute.xlu1 %543 }
 0x6e2   :  { %v546_v52 = vmul.f32 %v2540_v49, %v544_v51 }
 0x6e4   :  { %548 = vrot.lane.b32.xlu1 %v546_v52, %s2667_s3 }
 0x6ef   :  { %v651_v54 = vpop.permute.xlu0 %650 }
 0x6f0   :  { %v653_v55 = vmul.f32 %v2542_v53, %v651_v54 }
 0x6f2   :  { %655 = vrot.lane.b32.xlu0 %v653_v55, %s2667_s3 }
 0x756   :  { %v549_v58 = vpop.permute.xlu1 %548 }
 0x757   :  { %v2875_v59 = vadd.f32 %v549_v58, %v541_v57 }
 0x759   :  { %2543 = vtanh.f32 %v2875_v59  ;;  %v753_v42 = vrot.slane %v2875_v59, 6 }
 0x763   :  { %v2544_v60 = vpop.eup %2543 }
 0x764   :  { %v656_v62 = vpop.permute.xlu0 %655  ;;  %554 = vrot.lane.b32.xlu1 %v2544_v60, %s2666_s18 }
 0x765   :  { %v2880_v63 = vadd.f32 %v656_v62, %v648_v61 }
 0x767   :  { %2545 = vtanh.f32 %v2880_v63 }
 0x771   :  { %v2546_v0 = vpop.eup %2545 }
 0x772   :  { %661 = vrot.lane.b32.xlu0 %v2546_v0, %s2666_s18 }
 0x7d6   :  { %v555_v1 = vpop.permute.xlu1 %554 }
 0x7d7   :  { %v557_v2 = vmul.f32 %v2540_v49, %v555_v1 }
 0x7d9   :  { %v666_v5 = vrot.slane %v557_v2, 4  ;;  %772 = vrot.lane.b32.xlu0 %v557_v2, %s2667_s3 }
 0x7db   :  { %667 = vrot.lane.b32.xlu1 %v666_v5, %s2667_s3 }
 0x7e4   :  { %v662_v6 = vpop.permute.xlu0 %661 }
 0x7e5   :  { %v664_v7 = vmul.f32 %v2542_v53, %v662_v6 }
 0x7e7   :  { %v776_v8 = vrot.slane %v664_v7, 4 }
 0x7e9   :  { %777 = vrot.lane.b32.xlu1 %v776_v8, %s2666_s18 }
 0x84b   :  { %v773_v12 = vpop.permute.xlu0 %772 }
 0x84d   :  { %v668_v11 = vpop.permute.xlu1 %667 }
 0x84e   :  { %2180 = vmatmul.mubr.msk.f32.vlgmr.msra.gmra.mrb[4].mxu1 %vm140_vm2, %v668_v11 }
 0x84f   :  { %2401 = vmatpush3.bf16.msra.mxu1 %v2778_v32  ;;  %2198 = vmatprep.mubr.msk.f32.mxu1 %vm2664_vm1, %v2665_v10 }
 0x850   :  { %2402 = vmatprep.subr.bf16.mxu1 %v2663_v3 }
 0x853   :  { %2404 = vmatpush3.bf16.msra.mxu1 %v2784_v34 }
 0x854   :  { %2405 = vmatprep.subr.bf16.mxu1 %v2663_v3 }
 0x857   :  { %2407 = vmatpush3.bf16.msra.mxu1 %v2794_v37 }
 0x858   :  { %2408 = vmatprep.subr.bf16.mxu1 %v2663_v3 }
 0x85b   :  { %v778_v14 = vpop.permute.xlu1 %777  ;;  %2410 = vmatpush3.bf16.msra.mxu1 %v2805_v41 }
 0x85c   :  { %v780_v16 = vsel %vm140_vm2, %v773_v12, %v778_v14  ;;  %2429 = vmatprep.subr.bf16.mxu1 %v2663_v3 }
 0x85d   :  { %v782_v17 = vrot.slane %v780_v16, 4 }
 0x85f   :  { %2199 = vmatmul.mubr.msk.f32.vlgmr.msra.gmra.mrb[6].mxu1 %vm353_vm3, %v782_v17 }
 0x860   :  { %2431 = vmatpush3.bf16.msra.mxu1 %v2724_v4  ;;  %2239 = vmatprep.mubr.msk.f32.mxu1 %vm2664_vm1, %v2665_v10 }
 0x861   :  { %2432 = vmatprep.subr.bf16.mxu1 %v2663_v3 }
 0x864   :  { %2434 = vmatpush3.bf16.msra.mxu1 %v2739_v9 }
 0x865   :  { %2435 = vmatprep.subr.bf16.mxu1 %v2663_v3 }
 0x921   :  { %v737_v18 = vpop.f32.mrb[4].mxu1 }
 0x922   :  { %v742_v19 = vrot.slane %v737_v18, 2  ;;  %v2181_v20 = vpop.f32.mrb[5].mxu1 }
 0x924   :  { %v744_v21 = vadd.f32 %v742_v19, %v2761_v15 }
 0x926   :  { %2547 = vtanh.f32 %v744_v21  ;;  %v1951_v27 = vmul.f32 -1.442695, %v744_v21 }
 0x930   :  { %v2548_v22 = vpop.eup %2547 }
 0x931   :  { %757 = vrot.lane.b32.xlu0 %v2548_v22, %s2666_s18 }
 0x932   :  { %v851_v23 = vpop.f32.mrb[6].mxu1 }
 0x933   :  { %v852_v24 = vadd.f32 %v2829_v46, %v851_v23  ;;  %v2200_v25 = vpop.f32.mrb[7].mxu1 }
 0x935   :  { %2549 = vtanh.f32 %v852_v24  ;;  %v1953_v29 = vmul.f32 -1.442695, %v852_v24 }
 0x936   :  { %2551 = vpow2.f32 %v1951_v27 }
 0x937   :  { %2553 = vpow2.f32 %v1953_v29 }
 0x93f   :  { %v2550_v26 = vpop.eup %2549 }
 0x940   :  { %864 = vrot.lane.b32.xlu1 %v2550_v26, %s2666_s18  ;;  %v2552_v28 = vpop.eup %2551 }
 0x941   :  { %v748_v30 = vadd.f32 1.0, %v2552_v28  ;;  %v2554_v15 = vpop.eup %2553 }
 0x942   :  { %v858_v36 = vadd.f32 1.0, %v2554_v15 }
 0x943   :  { %2555 = vrcp.f32 %v748_v30 }
 0x944   :  { %2557 = vrcp.f32 %v858_v36 }
 0x94d   :  { %v2556_v31 = vpop.eup %2555 }
 0x94e   :  { %v2558_v38 = vpop.eup %2557  ;;  %v755_v43 = vmul.f32 %v2556_v31, %v753_v42 }
 0x94f   :  { %v862_v48 = vmul.f32 %v2558_v38, %v2880_v63 }
 0x9a3   :  { %v758_v33 = vpop.permute.xlu0 %757 }
 0x9a4   :  { %v760_v35 = vmul.f32 %v2556_v31, %v758_v33 }
 0x9a6   :  { %762 = vrot.lane.b32.xlu0 %v760_v35, %s2667_s3 }
 0x9b2   :  { %v865_v39 = vpop.permute.xlu1 %864 }
 0x9b3   :  { %v867_v40 = vmul.f32 %v2558_v38, %v865_v39 }
 0x9b5   :  { %869 = vrot.lane.b32.xlu1 %v867_v40, %s2667_s3 }
 0xa18   :  { %v763_v44 = vpop.permute.xlu0 %762 }
 0xa19   :  { %v2913_v45 = vadd.f32 %v763_v44, %v755_v43 }
 0xa1b   :  { %2559 = vtanh.f32 %v2913_v45  ;;  %v964_v25 = vrot.slane %v2913_v45, 6 }
 0xa25   :  { %v2560_v47 = vpop.eup %2559 }
 0xa26   :  { %768 = vrot.lane.b32.xlu0 %v2560_v47, %s2666_s18 }
 0xa27   :  { %v870_v49 = vpop.permute.xlu1 %869 }
 0xa28   :  { %v2918_v50 = vadd.f32 %v870_v49, %v862_v48 }
 0xa2a   :  { %2561 = vtanh.f32 %v2918_v50 }
 0xa34   :  { %v2562_v51 = vpop.eup %2561 }
 0xa35   :  { %875 = vrot.lane.b32.xlu1 %v2562_v51, %s2666_s18 }
 0xa98   :  { %v769_v52 = vpop.permute.xlu0 %768 }
 0xa99   :  { %v771_v53 = vmul.f32 %v2556_v31, %v769_v52 }
 0xa9b   :  { %v880_v54 = vrot.slane %v771_v53, 6  ;;  %983 = vrot.lane.b32.xlu1 %v771_v53, %s2667_s3 }
 0xa9d   :  { %881 = vrot.lane.b32.xlu0 %v880_v54, %s2667_s3 }
 0xaa7   :  { %v876_v55 = vpop.permute.xlu1 %875 }
 0xaa8   :  { %v878_v56 = vmul.f32 %v2558_v38, %v876_v55 }
 0xaaa   :  { %v987_v57 = vrot.slane %v878_v56, 2 }
 0xaac   :  { %988 = vrot.lane.b32.xlu0 %v987_v57, %s2666_s18 }
 0xb0d   :  { %v984_v59 = vpop.permute.xlu1 %983 }
 0xb0f   :  { %v882_v58 = vpop.permute.xlu0 %881 }
 0xb10   :  { %2210 = vmatmul.mubr.msk.f32.vlgmr.msra.gmra.mrb[8].mxu0 %vm140_vm2, %v882_v58 }
 0xb11   :  { %2419 = vmatpush3.bf16.msra.mxu0 %v2778_v32  ;;  %2228 = vmatprep.mubr.msk.f32.mxu0 %vm2664_vm1, %v2665_v10 }
 0xb12   :  { %2420 = vmatprep.subr.bf16.mxu0 %v2663_v3 }
 0xb15   :  { %2422 = vmatpush3.bf16.msra.mxu0 %v2784_v34 }
 0xb16   :  { %2423 = vmatprep.subr.bf16.mxu0 %v2663_v3 }
 0xb19   :  { %2425 = vmatpush3.bf16.msra.mxu0 %v2794_v37 }
 0xb1a   :  { %2426 = vmatprep.subr.bf16.mxu0 %v2663_v3 }
 0xb1d   :  { %2428 = vmatpush3.bf16.msra.mxu0 %v2805_v41 }
 0xb1e   :  { %2447 = vmatprep.subr.bf16.mxu0 %v2663_v3  ;;  %v989_v60 = vpop.permute.xlu0 %988 }
 0xb1f   :  { %v991_v61 = vsel %vm140_vm2, %v984_v59, %v989_v60 }
 0xb20   :  { %v993_v62 = vrot.slane %v991_v61, 6 }
 0xb22   :  { %2229 = vmatmul.mubr.msk.f32.vlgmr.msra.gmra.mrb[10].mxu0 %vm353_vm3, %v993_v62 }
 0xb23   :  { %2449 = vmatpush3.bf16.msra.mxu0 %v2724_v4  ;;  %2269 = vmatprep.mubr.msk.f32.mxu0 %vm2664_vm1, %v2665_v10 }
 0xb24   :  { %2450 = vmatprep.subr.bf16.mxu0 %v2663_v3 }
 0xb27   :  { %2452 = vmatpush3.bf16.msra.mxu0 %v2739_v9 }
 0xb28   :  { %2453 = vmatprep.subr.bf16.mxu0 %v2663_v3 }
 0xbe3   :  { %v951_v63 = vpop.f32.mrb[8].mxu0 }
 0xbe4   :  { %v955_v0 = vadd.f32 %v951_v63, %v2759_v13  ;;  %v2211_v1 = vpop.f32.mrb[9].mxu0 }
 0xbe6   :  { %2563 = vtanh.f32 %v955_v0  ;;  %v1955_v11 = vmul.f32 -1.442695, %v955_v0 }
 0xbf0   :  { %v2564_v2 = vpop.eup %2563 }
 0xbf1   :  { %968 = vrot.lane.b32.xlu1 %v2564_v2, %s2666_s18 }
 0xbf5   :  { %v1062_v5 = vpop.f32.mrb[10].mxu0 }
 0xbf6   :  { %v1063_v6 = vadd.f32 %v2829_v46, %v1062_v5  ;;  %v2230_v7 = vpop.f32.mrb[11].mxu0 }
 0xbf8   :  { %2565 = vtanh.f32 %v1063_v6  ;;  %v1957_v16 = vmul.f32 -1.442695, %v1063_v6 }
 0xbf9   :  { %2567 = vpow2.f32 %v1955_v11 }
 0xc02   :  { %v2566_v8 = vpop.eup %2565 }
 0xc03   :  { %1075 = vrot.lane.b32.xlu0 %v2566_v8, %s2666_s18  ;;  %v2568_v12 = vpop.eup %2567 }
 0xc04   :  { %v959_v14 = vadd.f32 1.0, %v2568_v12 }
 0xc06   :  { %2569 = vrcp.f32 %v959_v14 }
 0xc07   :  { %2571 = vpow2.f32 %v1957_v16 }
 0xc10   :  { %v2570_v17 = vpop.eup %2569 }
 0xc11   :  { %v2572_v20 = vpop.eup %2571  ;;  %v966_v26 = vmul.f32 %v2570_v17, %v964_v25 }
 0xc12   :  { %v1069_v21 = vadd.f32 1.0, %v2572_v20 }
 0xc14   :  { %2573 = vrcp.f32 %v1069_v21 }
 0xc1e   :  { %v2574_v22 = vpop.eup %2573 }
 0xc1f   :  { %v1073_v30 = vmul.f32 %v2574_v22, %v2918_v50 }
 0xc63   :  { %v969_v18 = vpop.permute.xlu1 %968 }
 0xc64   :  { %v971_v19 = vmul.f32 %v2570_v17, %v969_v18 }
 0xc66   :  { %973 = vrot.lane.b32.xlu1 %v971_v19, %s2667_s3 }
 0xc75   :  { %v1076_v23 = vpop.permute.xlu0 %1075 }
 0xc76   :  { %v1078_v24 = vmul.f32 %v2574_v22, %v1076_v23 }
 0xc78   :  { %1080 = vrot.lane.b32.xlu0 %v1078_v24, %s2667_s3 }
 0xcd8   :  { %v974_v27 = vpop.permute.xlu1 %973 }
 0xcd9   :  { %v2951_v28 = vadd.f32 %v974_v27, %v966_v26 }
 0xcdb   :  { %2575 = vtanh.f32 %v2951_v28  ;;  %v1177_v0 = vrot.slane %v2951_v28, 6 }
 0xce5   :  { %v2576_v29 = vpop.eup %2575 }
 0xce6   :  { %979 = vrot.lane.b32.xlu1 %v2576_v29, %s2666_s18 }
 0xcea   :  { %v1081_v15 = vpop.permute.xlu0 %1080 }
 0xceb   :  { %v2956_v31 = vadd.f32 %v1081_v15, %v1073_v30 }
 0xced   :  { %2577 = vtanh.f32 %v2956_v31 }
 0xcf7   :  { %v2578_v33 = vpop.eup %2577 }
 0xcf8   :  { %1086 = vrot.lane.b32.xlu0 %v2578_v33, %s2666_s18 }
 0xd58   :  { %v980_v35 = vpop.permute.xlu1 %979 }
 0xd59   :  { %v982_v36 = vmul.f32 %v2570_v17, %v980_v35 }
 0xd5b   :  { %1091 = vrot.lane.b32.xlu1 %v982_v36, %s2667_s3 }
 0xd6a   :  { %v1087_v38 = vpop.permute.xlu0 %1086 }
 0xd6b   :  { %v1089_v39 = vmul.f32 %v2574_v22, %v1087_v38 }
 0xd6d   :  { %1198 = vrot.lane.b32.xlu0 %v1089_v39, %s2666_s18 }
 0xdcd   :  { %v1092_v40 = vpop.permute.xlu1 %1091 }
 0xdce   :  { %2240 = vmatmul.mubr.msk.f32.vlgmr.msra.gmra.mrb[8].mxu1 %vm140_vm2, %v1092_v40 }
 0xdcf   :  { %2437 = vmatpush3.bf16.msra.mxu1 %v2778_v32  ;;  %2258 = vmatprep.mubr.msk.f32.mxu1 %vm2664_vm1, %v2665_v10 }
 0xdd0   :  { %2438 = vmatprep.subr.bf16.mxu1 %v2663_v3 }
 0xdd3   :  { %2440 = vmatpush3.bf16.msra.mxu1 %v2784_v34 }
 0xdd4   :  { %2441 = vmatprep.subr.bf16.mxu1 %v2663_v3 }
 0xdd7   :  { %2443 = vmatpush3.bf16.msra.mxu1 %v2794_v37 }
 0xdd8   :  { %2444 = vmatprep.subr.bf16.mxu1 %v2663_v3 }
 0xddb   :  { %2446 = vmatpush3.bf16.msra.mxu1 %v2805_v41 }
 0xddc   :  { %2465 = vmatprep.subr.bf16.mxu1 %v2663_v3 }
 0xddf   :  { %v1199_v42 = vpop.permute.xlu0 %1198 }
 0xde0   :  { %v1201_v43 = vsel %vm140_vm2, %v1092_v40, %v1199_v42 }
 0xde1   :  { %2259 = vmatmul.mubr.msk.f32.vlgmr.msra.gmra.mrb[10].mxu1 %vm353_vm3, %v1201_v43 }
 0xde2   :  { %2467 = vmatpush3.bf16.msra.mxu1 %v2724_v4  ;;  %2299 = vmatprep.mubr.msk.f32.mxu1 %vm2664_vm1, %v2665_v10 }
 0xde3   :  { %2468 = vmatprep.subr.bf16.mxu1 %v2663_v3 }
 0xde6   :  { %2470 = vmatpush3.bf16.msra.mxu1 %v2739_v9 }
 0xde7   :  { %2471 = vmatprep.subr.bf16.mxu1 %v2663_v3 }
 0xea1   :  { %v1161_v44 = vpop.f32.mrb[8].mxu1 }
 0xea2   :  { %v1166_v45 = vrot.slane %v1161_v44, 6  ;;  %v2241_v47 = vpop.f32.mrb[9].mxu1 }
 0xea4   :  { %v1168_v48 = vadd.f32 %v1166_v45, %v2759_v13 }
 0xea6   :  { %2579 = vtanh.f32 %v1168_v48  ;;  %v1959_v9 = vmul.f32 -1.442695, %v1168_v48 }
 0xeb0   :  { %v2580_v49 = vpop.eup %2579 }
 0xeb1   :  { %1181 = vrot.lane.b32.xlu1 %v2580_v49, %s2666_s18 }
 0xeb4   :  { %v1271_v50 = vpop.f32.mrb[10].mxu1 }
 0xeb5   :  { %v1272_v4 = vadd.f32 %v2829_v46, %v1271_v50  ;;  %v2260_v51 = vpop.f32.mrb[11].mxu1 }
 0xeb7   :  { %2581 = vtanh.f32 %v1272_v4  ;;  %v1961_v55 = vmul.f32 -1.442695, %v1272_v4 }
 0xeb8   :  { %2583 = vpow2.f32 %v1959_v9 }
 0xec1   :  { %v2582_v52 = vpop.eup %2581 }
 0xec2   :  { %1284 = vrot.lane.b32.xlu0 %v2582_v52, %s2666_s18  ;;  %v2584_v53 = vpop.eup %2583 }
 0xec3   :  { %v1172_v54 = vadd.f32 1.0, %v2584_v53 }
 0xec5   :  { %2585 = vrcp.f32 %v1172_v54 }
 0xec6   :  { %2587 = vpow2.f32 %v1961_v55 }
 0xecf   :  { %v2586_v56 = vpop.eup %2585 }
 0xed0   :  { %v2588_v58 = vpop.eup %2587  ;;  %v1179_v1 = vmul.f32 %v2586_v56, %v1177_v0 }
 0xed1   :  { %v1278_v60 = vadd.f32 1.0, %v2588_v58 }
 0xed3   :  { %2589 = vrcp.f32 %v1278_v60 }
 0xedd   :  { %v2590_v61 = vpop.eup %2589 }
 0xede   :  { %v1282_v7 = vmul.f32 %v2590_v61, %v2956_v31 }
 0xf23   :  { %v1182_v57 = vpop.permute.xlu1 %1181 }
 0xf24   :  { %v1184_v59 = vmul.f32 %v2586_v56, %v1182_v57 }
 0xf26   :  { %1186 = vrot.lane.b32.xlu1 %v1184_v59, %s2667_s3 }
 0xf34   :  { %v1285_v62 = vpop.permute.xlu0 %1284 }
 0xf35   :  { %v1287_v63 = vmul.f32 %v2590_v61, %v1285_v62 }
 0xf37   :  { %1289 = vrot.lane.b32.xlu0 %v1287_v63, %s2667_s3 }
 0xf98   :  { %v1187_v2 = vpop.permute.xlu1 %1186 }
 0xf99   :  { %v2988_v5 = vadd.f32 %v1187_v2, %v1179_v1 }
 0xf9b   :  { %2591 = vtanh.f32 %v2988_v5  ;;  %v1387_v4 = vrot.slane %v2988_v5, 6 }
 0xfa5   :  { %v2592_v6 = vpop.eup %2591 }
 0xfa6   :  { %1192 = vrot.lane.b32.xlu1 %v2592_v6, %s2666_s18 }
 0xfa9   :  { %v1290_v8 = vpop.permute.xlu0 %1289 }
 0xfaa   :  { %v2993_v11 = vadd.f32 %v1290_v8, %v1282_v7 }
 0xfac   :  { %2593 = vtanh.f32 %v2993_v11 }
 0xfb6   :  { %v2594_v12 = vpop.eup %2593 }
 0xfb7   :  { %1295 = vrot.lane.b32.xlu0 %v2594_v12, %s2666_s18 }
0x1018   :  { %v1193_v14 = vpop.permute.xlu1 %1192 }
0x1019   :  { %v1195_v16 = vmul.f32 %v2586_v56, %v1193_v14 }
0x101b   :  { %v1300_v17 = vrot.slane %v1195_v16, 2  ;;  %1406 = vrot.lane.b32.xlu0 %v1195_v16, %s2667_s3 }
0x101d   :  { %1301 = vrot.lane.b32.xlu1 %v1300_v17, %s2667_s3 }
0x1029   :  { %v1296_v18 = vpop.permute.xlu0 %1295 }
0x102a   :  { %v1298_v19 = vmul.f32 %v2590_v61, %v1296_v18 }
0x102c   :  { %v1410_v20 = vrot.slane %v1298_v19, 6 }
0x102e   :  { %1411 = vrot.lane.b32.xlu1 %v1410_v20, %s2666_s18 }
0x108d   :  { %v1407_v22 = vpop.permute.xlu0 %1406 }
0x108f   :  { %v1302_v21 = vpop.permute.xlu1 %1301 }
0x1090   :  { %2270 = vmatmul.mubr.msk.f32.vlgmr.msra.gmra.mrb[12].mxu0 %vm140_vm2, %v1302_v21 }
0x1091   :  { %2455 = vmatpush3.bf16.msra.mxu0 %v2778_v32  ;;  %2288 = vmatprep.mubr.msk.f32.mxu0 %vm2664_vm1, %v2665_v10 }
0x1092   :  { %2456 = vmatprep.subr.bf16.mxu0 %v2663_v3 }
0x1095   :  { %2458 = vmatpush3.bf16.msra.mxu0 %v2784_v34 }
0x1096   :  { %2459 = vmatprep.subr.bf16.mxu0 %v2663_v3 }
0x1099   :  { %2461 = vmatpush3.bf16.msra.mxu0 %v2794_v37 }
0x109a   :  { %2462 = vmatprep.subr.bf16.mxu0 %v2663_v3 }
0x109d   :  { %2464 = vmatpush3.bf16.msra.mxu0 %v2805_v41 }
0x109e   :  { %2483 = vmatprep.subr.bf16.mxu0 %v2663_v3 }
0x10a0   :  { %v1412_v23 = vpop.permute.xlu1 %1411 }
0x10a1   :  { %v1414_v24 = vsel %vm140_vm2, %v1407_v22, %v1412_v23 }
0x10a2   :  { %v1416_v25 = vrot.slane %v1414_v24, 2 }
0x10a4   :  { %2289 = vmatmul.mubr.msk.f32.vlgmr.msra.gmra.mrb[14].mxu0 %vm353_vm3, %v1416_v25 }
0x10a5   :  { %2485 = vmatpush3.bf16.msra.mxu0 %v2778_v32  ;;  %2337 = vmatprep.mubr.msk.f32.mxu0 %vm2664_vm1, %v2665_v10 }
0x10a6   :  { %2486 = vmatprep.subr.bf16.mxu0 %v2663_v3 }
0x10a9   :  { %2488 = vmatpush3.bf16.msra.mxu0 %v2784_v34 }
0x10aa   :  { %2489 = vmatprep.subr.bf16.mxu0 %v2663_v3 }
0x10ad   :  { %2491 = vmatpush3.bf16.msra.mxu0 %v2794_v37 }
0x10ae   :  { %2492 = vmatprep.subr.bf16.mxu0 %v2663_v3 }
0x10b1   :  { %2494 = vmatpush3.bf16.msra.mxu0 %v2805_v41 }
0x1163   :  { %v1371_v26 = vpop.f32.mrb[12].mxu0 }
0x1164   :  { %v1376_v27 = vrot.slane %v1371_v26, 4  ;;  %v2271_v28 = vpop.f32.mrb[13].mxu0 }
0x1166   :  { %v1378_v29 = vadd.f32 %v1376_v27, %v2759_v13 }
0x1168   :  { %2595 = vtanh.f32 %v1378_v29  ;;  %v1963_v36 = vmul.f32 -1.442695, %v1378_v29 }
0x1172   :  { %v2596_v30 = vpop.eup %2595 }
0x1173   :  { %1391 = vrot.lane.b32.xlu0 %v2596_v30, %s2666_s18 }
0x1177   :  { %v1485_v15 = vpop.f32.mrb[14].mxu0 }
0x1178   :  { %v1486_v31 = vadd.f32 %v2829_v46, %v1485_v15  ;;  %v2290_v33 = vpop.f32.mrb[15].mxu0 }
0x117a   :  { %2597 = vtanh.f32 %v1486_v31  ;;  %v1965_v40 = vmul.f32 -1.442695, %v1486_v31 }
0x117b   :  { %2599 = vpow2.f32 %v1963_v36 }
0x1184   :  { %v2598_v35 = vpop.eup %2597 }
0x1185   :  { %1498 = vrot.lane.b32.xlu1 %v2598_v35, %s2666_s18  ;;  %v2600_v38 = vpop.eup %2599 }
0x1186   :  { %v1382_v39 = vadd.f32 1.0, %v2600_v38 }
0x1188   :  { %2601 = vrcp.f32 %v1382_v39 }
0x1189   :  { %2603 = vpow2.f32 %v1965_v40 }
0x1192   :  { %v2602_v42 = vpop.eup %2601 }
0x1193   :  { %v2604_v45 = vpop.eup %2603  ;;  %v1389_v51 = vmul.f32 %v2602_v42, %v1387_v4 }
0x1194   :  { %v1492_v47 = vadd.f32 1.0, %v2604_v45 }
0x1196   :  { %2605 = vrcp.f32 %v1492_v47 }
0x11a0   :  { %v2606_v48 = vpop.eup %2605 }
0x11a1   :  { %v1496_v54 = vmul.f32 %v2606_v48, %v2993_v11 }
0x11e5   :  { %v1392_v43 = vpop.permute.xlu0 %1391 }
0x11e6   :  { %v1394_v44 = vmul.f32 %v2602_v42, %v1392_v43 }
0x11e8   :  { %1396 = vrot.lane.b32.xlu0 %v1394_v44, %s2667_s3 }
0x11f7   :  { %v1499_v49 = vpop.permute.xlu1 %1498 }
0x11f8   :  { %v1501_v50 = vmul.f32 %v2606_v48, %v1499_v49 }
0x11fa   :  { %1503 = vrot.lane.b32.xlu1 %v1501_v50, %s2667_s3 }
0x125a   :  { %v1397_v52 = vpop.permute.xlu0 %1396 }
0x125b   :  { %v3029_v9 = vadd.f32 %v1397_v52, %v1389_v51 }
0x125d   :  { %2607 = vtanh.f32 %v3029_v9  ;;  %v1601_v26 = vrot.slane %v3029_v9, 6 }
0x1267   :  { %v2608_v53 = vpop.eup %2607 }
0x1268   :  { %1402 = vrot.lane.b32.xlu0 %v2608_v53, %s2666_s18 }
0x126c   :  { %v1504_v55 = vpop.permute.xlu1 %1503 }
0x126d   :  { %v3034_v56 = vadd.f32 %v1504_v55, %v1496_v54 }
0x126f   :  { %2609 = vtanh.f32 %v3034_v56 }
0x1279   :  { %v2610_v57 = vpop.eup %2609 }
0x127a   :  { %1509 = vrot.lane.b32.xlu1 %v2610_v57, %s2666_s18 }
0x12da   :  { %v1403_v58 = vpop.permute.xlu0 %1402 }
0x12db   :  { %v1405_v59 = vmul.f32 %v2602_v42, %v1403_v58 }
0x12dd   :  { %v1514_v60 = vrot.slane %v1405_v59, 4  ;;  %1620 = vrot.lane.b32.xlu1 %v1405_v59, %s2667_s3  ;;  %v46_v59 = vld [vmem:[%s3110_s6 + $0x8] sm:$0xff] }
0x12df   :  { %1515 = vrot.lane.b32.xlu0 %v1514_v60, %s2667_s3  ;;  %v47_v60 = vld [vmem:[%s3110_s6 + $0x10] sm:$0xff] }
0x12ec   :  { %v1510_v61 = vpop.permute.xlu1 %1509 }
0x12ed   :  { %v1512_v62 = vmul.f32 %v2606_v48, %v1510_v61 }
0x12ef   :  { %v1624_v63 = vrot.slane %v1512_v62, 4  ;;  %v48_v62 = vld [vmem:[%s3110_s6 + $0x18] sm:$0xff] }
0x12f1   :  { %1625 = vrot.lane.b32.xlu0 %v1624_v63, %s2666_s18  ;;  %v2499_v63 = vpack.c.bf16 %v48_v62, %v47_v60 }
0x134f   :  { %v1621_v1 = vpop.permute.xlu1 %1620 }
0x1351   :  { %v1516_v0 = vpop.permute.xlu0 %1515 }
0x1352   :  { %2300 = vmatmul.mubr.msk.f32.vlgmr.msra.gmra.mrb[12].mxu1 %vm140_vm2, %v1516_v0 }
0x1353   :  { %2473 = vmatpush3.bf16.msra.mxu1 %v2778_v32  ;;  %2318 = vmatprep.mubr.msk.f32.mxu1 %vm2664_vm1, %v2665_v10 }
0x1354   :  { %2474 = vmatprep.subr.bf16.mxu1 %v2663_v3 }
0x1357   :  { %2476 = vmatpush3.bf16.msra.mxu1 %v2784_v34 }
0x1358   :  { %2477 = vmatprep.subr.bf16.mxu1 %v2663_v3 }
0x135b   :  { %2479 = vmatpush3.bf16.msra.mxu1 %v2794_v37 }
0x135c   :  { %2480 = vmatprep.subr.bf16.mxu1 %v2663_v3 }
0x135f   :  { %2482 = vmatpush3.bf16.msra.mxu1 %v2805_v41 }
0x1360   :  { %2495 = vmatprep.subr.bf16.mxu1 %v2663_v3 }
0x1363   :  { %v1626_v2 = vpop.permute.xlu0 %1625 }
0x1364   :  { %v1628_v32 = vsel %vm140_vm2, %v1621_v1, %v1626_v2 }
0x1365   :  { %v1630_v5 = vrot.slane %v1628_v32, 4 }
0x1367   :  { %2319 = vmatmul.mubr.msk.f32.vlgmr.msra.gmra.mrb[14].mxu1 %vm353_vm3, %v1630_v5  ;;  %v1972_v5 = vld [vmem:[%s3111_s7] ss:$0 sm:$0xff] }
0x1368   :  { %2348 = vmatprep.mubr.msk.f32.mxu1 %vm2664_vm1, %v2665_v10 }
0x1425   :  { %v1585_v34 = vpop.f32.mrb[12].mxu1 }
0x1426   :  { %v1590_v6 = vrot.slane %v1585_v34, 2  ;;  %v2301_v7 = vpop.f32.mrb[13].mxu1 }
0x1428   :  { %v1592_v37 = vadd.f32 %v1590_v6, %v2759_v13 }
0x142a   :  { %2611 = vtanh.f32 %v1592_v37  ;;  %v1967_v16 = vmul.f32 -1.442695, %v1592_v37 }
0x1434   :  { %v2612_v8 = vpop.eup %2611 }
0x1435   :  { %1605 = vrot.lane.b32.xlu0 %v2612_v8, %s2666_s18 }
0x143a   :  { %v1699_v41 = vpop.f32.mrb[14].mxu1 }
0x143b   :  { %v1700_v11 = vadd.f32 %v2829_v46, %v1699_v41  ;;  %v2320_v12 = vpop.f32.mrb[15].mxu1 }
0x143d   :  { %2613 = vtanh.f32 %v1700_v11  ;;  %v1969_v18 = vmul.f32 -1.442695, %v1700_v11 }
0x143e   :  { %2615 = vpow2.f32 %v1967_v16 }
0x1447   :  { %v2614_v14 = vpop.eup %2613 }
0x1448   :  { %1712 = vrot.lane.b32.xlu1 %v2614_v14, %s2666_s18  ;;  %v2616_v10 = vpop.eup %2615 }
0x1449   :  { %v1596_v17 = vadd.f32 1.0, %v2616_v10 }
0x144b   :  { %2617 = vrcp.f32 %v1596_v17 }
0x144c   :  { %2619 = vpow2.f32 %v1969_v18 }
0x1455   :  { %v2618_v13 = vpop.eup %2617 }
0x1456   :  { %v2620_v21 = vpop.eup %2619  ;;  %v1603_v27 = vmul.f32 %v2618_v13, %v1601_v26 }
0x1457   :  { %v1706_v22 = vadd.f32 1.0, %v2620_v21 }
0x1459   :  { %2621 = vrcp.f32 %v1706_v22 }
0x1463   :  { %v2622_v23 = vpop.eup %2621 }
0x1464   :  { %v1710_v15 = vmul.f32 %v2622_v23, %v3034_v56 }
0x14a7   :  { %v1606_v19 = vpop.permute.xlu0 %1605 }
0x14a8   :  { %v1608_v20 = vmul.f32 %v2618_v13, %v1606_v19 }
0x14aa   :  { %1610 = vrot.lane.b32.xlu0 %v1608_v20, %s2667_s3 }
0x14ba   :  { %v1713_v24 = vpop.permute.xlu1 %1712 }
0x14bb   :  { %v1715_v25 = vmul.f32 %v2622_v23, %v1713_v24 }
0x14bd   :  { %1717 = vrot.lane.b32.xlu1 %v1715_v25, %s2667_s3 }
0x151c   :  { %v1611_v28 = vpop.permute.xlu0 %1610 }
0x151d   :  { %v1613_v29 = vadd.f32 %v1611_v28, %v1603_v27 }
0x151f   :  { %2623 = vtanh.f32 %v1613_v29 }
0x1529   :  { %v2624_v30 = vpop.eup %2623 }
0x152a   :  { %1616 = vrot.lane.b32.xlu0 %v2624_v30, %s2666_s18 }
0x152f   :  { %v1718_v31 = vpop.permute.xlu1 %1717 }
0x1530   :  { %v1720_v33 = vadd.f32 %v1718_v31, %v1710_v15 }
0x1532   :  { %2625 = vtanh.f32 %v1720_v33 }
0x153c   :  { %v2626_v35 = vpop.eup %2625 }
0x153d   :  { %1723 = vrot.lane.b32.xlu1 %v2626_v35, %s2666_s18 }
0x159c   :  { %v1617_v36 = vpop.permute.xlu0 %1616 }
0x159d   :  { %v1619_v38 = vmul.f32 %v2618_v13, %v1617_v36 }
0x159f   :  { %1728 = vrot.lane.b32.xlu1 %v1619_v38, %s2667_s3 }
0x15af   :  { %v1724_v39 = vpop.permute.xlu1 %1723 }
0x15b0   :  { %v1726_v40 = vmul.f32 %v2622_v23, %v1724_v39 }
0x15b2   :  { %v1732_v42 = vrot.slane %v1726_v40, 2 }
0x15b4   :  { %1733 = vrot.lane.b32.xlu0 %v1732_v42, %s2666_s18 }
0x1611   :  { %v1729_v43 = vpop.permute.xlu1 %1728 }
0x1626   :  { %v1734_v44 = vpop.permute.xlu0 %1733 }
0x1627   :  { %v1736_v45 = vsel %vm140_vm2, %v1729_v43, %v1734_v44 }
0x1628   :  { %v1738_v47 = vrot.slane %v1736_v45, 6 }
0x162a   :  { %2338 = vmatmul.mubr.msk.f32.vlgmr.msra.gmra.mrb[16].mxu0 %vm353_vm3, %v1738_v47 }
0x16fd   :  { %v1807_v48 = vpop.f32.mrb[16].mxu0 }
0x16fe   :  { %v1808_v49 = vadd.f32 %v2829_v46, %v1807_v48  ;;  %v2339_v50 = vpop.f32.mrb[17].mxu0  ;;  %v45_v46 = vld [vmem:[%s3110_s6] sm:$0xff]  ;;  %s2668_s6 = smov [#allocation2]  }
0x16ff   :  { %v2496_v61 = vpack.c.bf16 %v46_v59, %v45_v46 }
0x1700   :  { %2627 = vtanh.f32 %v1808_v49  ;;  %v1971_v51 = vmul.f32 -1.442695, %v1808_v49 }
0x1701   :  { %2497 = vmatpush3.bf16.msra.mxu1 %v2496_v61 }
0x1702   :  { %2629 = vpow2.f32 %v1971_v51  ;;  %2498 = vmatprep.subr.bf16.mxu1 %v2663_v3 }
0x1705   :  { %2500 = vmatpush3.bf16.msra.mxu1 %v2499_v63 }
0x170a   :  { %v2628_v4 = vpop.eup %2627 }
0x170b   :  { %1820 = vrot.lane.b32.xlu1 %v2628_v4, %s2666_s18 }
0x170c   :  { %v2630_v52 = vpop.eup %2629 }
0x170d   :  { %v1814_v9 = vadd.f32 1.0, %v2630_v52 }
0x170f   :  { %2631 = vrcp.f32 %v1814_v9 }
0x1719   :  { %v2632_v53 = vpop.eup %2631 }
0x171a   :  { %v1818_v56 = vmul.f32 %v2632_v53, %v1720_v33 }
0x177d   :  { %v1821_v54 = vpop.permute.xlu1 %1820 }
0x177e   :  { %v1823_v55 = vmul.f32 %v2632_v53, %v1821_v54 }
0x1780   :  { %1825 = vrot.lane.b32.xlu0 %v1823_v55, %s2667_s3 }
0x17f2   :  { %v1826_v57 = vpop.permute.xlu0 %1825 }
0x17f3   :  { %v1828_v58 = vadd.f32 %v1826_v57, %v1818_v56 }
0x17f5   :  { %2633 = vtanh.f32 %v1828_v58 }
0x17ff   :  { %v2634_v0 = vpop.eup %2633 }
0x1800   :  { %1831 = vrot.lane.b32.xlu1 %v2634_v0, %s2666_s18  ;;  %s1929_s18 = sshll.u32 %s2668_s6, 4  ;;  %s1930_s18 = int_to_ptr.vmem [resolvable:$true] %s1929_s18 }
0x1801   :  { %p2644_p1 = scmp.lt.s32.totalorder %s1930_s18, %s1930_s18 }
0x1872   :  { %v1832_v1 = vpop.permute.xlu1 %1831 }
0x1873   :  { %v1834_v2 = vmul.f32 %v2632_v53, %v1832_v1 }
0x1875   :  { %1842 = vrot.lane.b32.xlu0 %v1834_v2, %s2667_s3  ;;  %s2639_s3 = scalar_lea.vmem %s1930_s18, 32 }
0x1876   :  { %p2640_p0 = scmp.ne.s32.totalorder %s1930_s18, %s2639_s3  ;;  %p2645_p2 = scmp.lt.s32.totalorder %s2639_s3, %s2639_s3 }
0x1878   :  { %p2646_p3 = por %p2645_p2, %p2644_p1 }
0x187a   :  { %p2647_p4 = pnand %p2646_p3, %p2640_p0 }
0x18e7   :  { %v1843_v32 = vpop.permute.xlu0 %1842 }
0x18e8   :  { %2349 = vmatmul.mubr.msk.f32.vlgmr.msra.gmra.mrb[16].mxu1 %vm140_vm2, %v1843_v32 }
0x19bb   :  { %v1912_v34 = vpop.f32.mrb[16].mxu1 }
0x19bc   :  { %v1913_v6 = vadd.f32 %v1972_v5, %v1912_v34  ;;  %v2350_v7 = vpop.f32.mrb[17].mxu1 }
0x19be   :  { %v1974_v37 = vmul.f32 -1.442695, %v1913_v6 }
0x19c0   :  { %2635 = vpow2.f32 %v1974_v37 }
0x19ca   :  { %v2636_v3 = vpop.eup %2635 }
0x19cb   :  { %v1919_v8 = vadd.f32 1.0, %v2636_v3 }
0x19cd   :  { %2637 = vrcp.f32 %v1919_v8 }
0x19d7   :  { %v2638_v41 = vpop.eup %2637 }
0x19d8   :  { %1922 = vst [vmem:[#allocation2] sm:$0x3] %v2638_v41 }
0x19d9   :  { %2650 = shalt.err (!%p2647_p4)
}
0x19da   :  { %s2651_s22 = scalar_lea.hbm %s3112_s8, 32 }
0x19db   :  { %p2652_p5 = scmp.ne.s32.totalorder %s3112_s8, %s2651_s22  ;;  %p2655_p6 = scmp.lt.u32.totalorder %s2651_s22, %s3112_s8 }
0x19dd   :  { %p2657_p7 = pnand %p2655_p6, %p2652_p5 }
0x19df   :  { %2660 = shalt.err (!%p2657_p7)
}
0x19e0   :  { %1932 = dma.vmem_to_hbm [thread:$0]  %s1930_s18, 32, %s3112_s8, [#allocation3]  }
0x19e1   :  { %2661 = dma.done.wait [#allocation3], 32  }
0x19e2   :  { %2662 = vsyncadd [#allocation3], 4294967264 }
0x19e3   :  { %1936 = vsyncpa [#allocation3], 1 }

</bundles_post_ra>
